<compile_context>
chip_gen: v7x
topology: tpu7x:2x2x1
jax: 0.10.0
libtpu: 0.0.40
codegen_flags: <defaults>
</compile_context>

<pallas_src>
import jax
import jax.numpy as jnp
import numpy as np
from jax import lax
from jax.experimental import pallas as pl
from jax.experimental.pallas import tpu as pltpu


def _round_up(x, m):
    return ((x + m - 1) // m) * m


# ----------------------------------------------------------------------------
# Kernel: single invocation, statically unrolled GRU over T timesteps.
# ----------------------------------------------------------------------------
def _make_gru_kernel(T, B_pad, V, H, Hp):
    def kernel(seqlen_ref, items_ref, tproj_ref, wh_ref, bh_ref, out_ref, gi_ref):
        # Hidden state accumulates directly in the VMEM-resident output block.
        out_ref[...] = jnp.zeros((B_pad, Hp), jnp.float32)

        # ---- time-invariant input path (hoisted out of the recurrence) ----------
        # One one-hot for all T timesteps, one MXU dot against the pre-projected
        # embedding table (emb @ Wi + bi already fused), stored to VMEM scratch.
        ids = items_ref[...]                                               # (T*B_pad, 1)
        onehot = (ids == lax.broadcasted_iota(jnp.int32, (T * B_pad, V), 1)
                  ).astype(jnp.float32)                                    # (T*B_pad, V)
        gi_ref[...] = jnp.dot(onehot, tproj_ref[...],
                              preferred_element_type=jnp.float32)          # (T*B_pad, 3Hp)

        seq_lens = seqlen_ref[...]                                         # (B_pad, 1)
        wh = wh_ref[...]                                                   # (H, 3*Hp)
        bh = bh_ref[...]                                                   # (B_pad, 3*Hp)

        # ---- serial GRU recurrence: one small MXU dot per step ------------------
        for t in range(T):                               # static unroll (T is small)
            gi = gi_ref[t * B_pad:(t + 1) * B_pad, :]                      # (B_pad, 3Hp)
            h = out_ref[...]                                               # (B_pad, Hp)
            # Only the first H lanes of h are ever nonzero -> contract over H rows.
            gh = jnp.dot(h[:, :H], wh, preferred_element_type=jnp.float32) + bh

            # PyTorch GRU gate equations (gate order r, z, n); lane-aligned chunks.
            r = jax.nn.sigmoid(gi[:, 0:Hp] + gh[:, 0:Hp])
            z = jax.nn.sigmoid(gi[:, Hp:2 * Hp] + gh[:, Hp:2 * Hp])
            n = jnp.tanh(gi[:, 2 * Hp:3 * Hp] + r * gh[:, 2 * Hp:3 * Hp])
            h_new = (1.0 - z) * n + z * h

            # pack_padded_sequence semantics: freeze rows whose sequence has ended.
            alive = seq_lens > t                                           # (B_pad, 1)
            out_ref[...] = jnp.where(alive, h_new, h)

    return kernel


# ----------------------------------------------------------------------------
# Wrapper: fuse/pad parameters, launch one pallas_call, unpad the result.
# ----------------------------------------------------------------------------
def rnn_state_agg_pallas(items, seq_lens, embedding_table, gru_params):
    """items: (T, B) int32, seq_lens: (B,) int32 -> final hidden state (B, H)."""
    T, B = items.shape
    V, E = embedding_table.shape
    H = gru_params["W_hr"].shape[0]

    B_pad = _round_up(B, 8)      # sublane tile
    Hp = _round_up(H, 128)       # lane tile per gate chunk

    # Fused, lane-aligned [r | z | n] input projection with biases pre-added
    # (b_ir+b_hr and b_iz+b_hz fuse; b_hn must stay on the hidden side).
    Wi = jnp.zeros((E, 3 * Hp), jnp.float32)
    Wi = Wi.at[:, 0 * Hp:0 * Hp + H].set(gru_params["W_ir"])
    Wi = Wi.at[:, 1 * Hp:1 * Hp + H].set(gru_params["W_iz"])
    Wi = Wi.at[:, 2 * Hp:2 * Hp + H].set(gru_params["W_in"])
    bi = jnp.zeros((1, 3 * Hp), jnp.float32)
    bi = bi.at[:, 0 * Hp:0 * Hp + H].set(gru_params["b_ir"] + gru_params["b_hr"])
    bi = bi.at[:, 1 * Hp:1 * Hp + H].set(gru_params["b_iz"] + gru_params["b_hz"])
    bi = bi.at[:, 2 * Hp:2 * Hp + H].set(gru_params["b_in"])
    # Pre-project the whole (tiny) embedding table: per-timestep input work in the
    # kernel reduces to an exact row pick via one-hot @ table_proj.
    table_proj = embedding_table.astype(jnp.float32) @ Wi + bi            # (V, 3*Hp)

    # Recurrent weights: contract only over the H live lanes of h (K = H, not Hp).
    Wh = jnp.zeros((H, 3 * Hp), jnp.float32)
    Wh = Wh.at[:, 0 * Hp:0 * Hp + H].set(gru_params["W_hr"])
    Wh = Wh.at[:, 1 * Hp:1 * Hp + H].set(gru_params["W_hz"])
    Wh = Wh.at[:, 2 * Hp:2 * Hp + H].set(gru_params["W_hn"])

    # Hidden-side bias (only the n chunk), pre-broadcast so the kernel never
    # re-materializes a broadcast inside the time loop.
    bh = jnp.zeros((B_pad, 3 * Hp), jnp.float32)
    bh = bh.at[:, 2 * Hp:2 * Hp + H].set(jnp.broadcast_to(gru_params["b_hn"], (B_pad, H)))

    # Pad batch; dead rows get token 0 and seq_len 0, so they stay masked off (h = 0).
    items_p = jnp.zeros((T, B_pad), jnp.int32).at[:, :B].set(items.astype(jnp.int32))
    items_p = items_p.reshape(T * B_pad, 1)                                # row t*B_pad+b
    seq_lens_p = jnp.zeros((B_pad, 1), jnp.int32).at[:B, 0].set(seq_lens.astype(jnp.int32))

    kernel = _make_gru_kernel(T, B_pad, V, H, Hp)
    vmem = pl.BlockSpec(memory_space=pltpu.MemorySpace.VMEM)

    h_pad = pl.pallas_call(
        kernel,
        out_shape=jax.ShapeDtypeStruct((B_pad, Hp), jnp.float32),
        in_specs=[vmem,          # seq_lens   (B_pad, 1)
                  vmem,          # items      (T*B_pad, 1)
                  vmem,          # table_proj (V, 3*Hp)
                  vmem,          # W_h fused  (H, 3*Hp)
                  vmem],         # b_h tile   (B_pad, 3*Hp)
        out_specs=vmem,
        scratch_shapes=[pltpu.VMEM((T * B_pad, 3 * Hp), jnp.float32)],     # Gi for all t
    )(seq_lens_p, items_p, table_proj, Wh, bh)

    return h_pad[:B, :H]


# ----------------------------------------------------------------------------
# Pure-JAX reference (same math) used to validate the kernel.
# ----------------------------------------------------------------------------
def rnn_state_agg_ref(items, seq_lens, embedding_table, p):
    x = jnp.take(embedding_table, items, axis=0)  # (T, B, E)
    T, B, _ = x.shape
    H = p["W_hr"].shape[0]
    h0 = jnp.zeros((B, H), jnp.float32)

    def step(h, inp):
        x_t, t = inp
        r = jax.nn.sigmoid(x_t @ p["W_ir"] + p["b_ir"] + h @ p["W_hr"] + p["b_hr"])
        z = jax.nn.sigmoid(x_t @ p["W_iz"] + p["b_iz"] + h @ p["W_hz"] + p["b_hz"])
        n = jnp.tanh(x_t @ p["W_in"] + p["b_in"] + r * (h @ p["W_hn"] + p["b_hn"]))
        h_new = (1.0 - z) * n + z * h
        h = jnp.where((t < seq_lens)[:, None], h_new, h)
        return h, None

    h, _ = lax.scan(step, h0, (x, jnp.arange(T)))
    return h


if __name__ == "__main__":
    # Small shapes implied by the module: seq=8, batch=4, vocab=16,
    # embedding_dim=32, rnn_dim (hidden)=32.
    T, B, V, E, H = 8, 4, 16, 32, 32

    key = jax.random.PRNGKey(0)
    keys = jax.random.split(key, 16)

    # Deterministic parameter init (mimics PyTorch uniform(-1/sqrt(H), 1/sqrt(H))).
    s = 1.0 / np.sqrt(H)
    embedding_table = jax.random.normal(keys[0], (V, E), jnp.float32)
    gru_params = {
        "W_ir": jax.random.uniform(keys[1], (E, H), jnp.float32, -s, s),
        "W_iz": jax.random.uniform(keys[2], (E, H), jnp.float32, -s, s),
        "W_in": jax.random.uniform(keys[3], (E, H), jnp.float32, -s, s),
        "W_hr": jax.random.uniform(keys[4], (H, H), jnp.float32, -s, s),
        "W_hz": jax.random.uniform(keys[5], (H, H), jnp.float32, -s, s),
        "W_hn": jax.random.uniform(keys[6], (H, H), jnp.float32, -s, s),
        "b_ir": jax.random.uniform(keys[7], (1, H), jnp.float32, -s, s),
        "b_iz": jax.random.uniform(keys[8], (1, H), jnp.float32, -s, s),
        "b_in": jax.random.uniform(keys[9], (1, H), jnp.float32, -s, s),
        "b_hr": jax.random.uniform(keys[10], (1, H), jnp.float32, -s, s),
        "b_hz": jax.random.uniform(keys[11], (1, H), jnp.float32, -s, s),
        "b_hn": jax.random.uniform(keys[12], (1, H), jnp.float32, -s, s),
    }

    # state.items: (T, B) token ids (batch_first=False); variable sequence lengths.
    items = jax.random.randint(keys[13], (T, B), 0, V, jnp.int32)
    seq_lens = jnp.array([8, 5, 3, 6], dtype=jnp.int32)

    h_kernel = jax.block_until_ready(
        rnn_state_agg_pallas(items, seq_lens, embedding_table, gru_params))

    h_ref = jax.block_until_ready(
        rnn_state_agg_ref(items, seq_lens, embedding_table, gru_params))

    np.testing.assert_allclose(np.asarray(h_kernel), np.asarray(h_ref),
                               rtol=1e-4, atol=1e-5)
    assert h_kernel.shape == (B, H)
    print("KERNEL_OK")
</pallas_src>

<mosaic_0001>
module attributes {stable_mosaic.version = 11 : i64} {
  func.func @kernel(%arg0: memref<8x1xi32, #tpu.memory_space<vmem>>, %arg1: memref<64x1xi32, #tpu.memory_space<vmem>>, %arg2: memref<16x384xf32, #tpu.memory_space<vmem>>, %arg3: memref<32x384xf32, #tpu.memory_space<vmem>>, %arg4: memref<8x384xf32, #tpu.memory_space<vmem>>, %arg5: memref<8x128xf32, #tpu.memory_space<vmem>>, %arg6: memref<64x384xf32, #tpu.memory_space<vmem>>) attributes {dimension_semantics = [], scalar_prefetch = 0 : i64, scratch_operands = 1 : i64, tpu.core_type = #tpu.core_type<tc>} {
    %cst = arith.constant 0.000000e+00 : f32
    %0 = vector.broadcast %cst : f32 to vector<8x128xf32>
    %c0 = arith.constant 0 : index
    %c0_0 = arith.constant 0 : index
    %1 = vector.load %arg5[%c0, %c0_0] : memref<8x128xf32, #tpu.memory_space<vmem>>, vector<8x128xf32>
    tpu.vector_store %arg5[%c0, %c0_0], %0 {strides = array<i32>} : memref<8x128xf32, #tpu.memory_space<vmem>>, vector<8x128xf32>,
    %c0_1 = arith.constant 0 : index
    %c0_2 = arith.constant 0 : index
    %2 = vector.load %arg1[%c0_1, %c0_2] : memref<64x1xi32, #tpu.memory_space<vmem>>, vector<64x1xi32>
    %3 = tpu.iota {dimensions = array<i32: 1>} : vector<64x16xi32>
    %4 = vector.broadcast %2 : vector<64x1xi32> to vector<64x16xi32>
    %5 = arith.cmpi eq, %4, %3 : vector<64x16xi32>
    %6 = arith.extui %5 : vector<64x16xi1> to vector<64x16xi32>
    %7 = arith.sitofp %6 : vector<64x16xi32> to vector<64x16xf32>
    %c0_3 = arith.constant 0 : index
    %c0_4 = arith.constant 0 : index
    %8 = vector.load %arg2[%c0_3, %c0_4] : memref<16x384xf32, #tpu.memory_space<vmem>>, vector<16x384xf32>
    %cst_5 = arith.constant dense<0.000000e+00> : vector<64x384xf32>
    %9 = tpu.matmul %7, %8, %cst_5 {dimension_numbers = #tpu.dot_dimension_numbers<[1], [0], [0], [1], [0, 0, 1, 1], [], []>} : vector<64x16xf32>, vector<16x384xf32>, vector<64x384xf32> -> vector<64x384xf32>
    %c0_6 = arith.constant 0 : index
    %c0_7 = arith.constant 0 : index
    %10 = vector.load %arg6[%c0_6, %c0_7] : memref<64x384xf32, #tpu.memory_space<vmem>>, vector<64x384xf32>
    tpu.vector_store %arg6[%c0_6, %c0_7], %9 {strides = array<i32>} : memref<64x384xf32, #tpu.memory_space<vmem>>, vector<64x384xf32>,
    %c0_8 = arith.constant 0 : index
    %c0_9 = arith.constant 0 : index
    %11 = vector.load %arg0[%c0_8, %c0_9] : memref<8x1xi32, #tpu.memory_space<vmem>>, vector<8x1xi32>
    %c0_10 = arith.constant 0 : index
    %c0_11 = arith.constant 0 : index
    %12 = vector.load %arg3[%c0_10, %c0_11] : memref<32x384xf32, #tpu.memory_space<vmem>>, vector<32x384xf32>
    %c0_12 = arith.constant 0 : index
    %c0_13 = arith.constant 0 : index
    %13 = vector.load %arg4[%c0_12, %c0_13] : memref<8x384xf32, #tpu.memory_space<vmem>>, vector<8x384xf32>
    %c0_14 = arith.constant 0 : index
    %c0_15 = arith.constant 0 : index
    %14 = vector.load %arg6[%c0_14, %c0_15] : memref<64x384xf32, #tpu.memory_space<vmem>>, vector<8x384xf32>
    %c0_16 = arith.constant 0 : index
    %c0_17 = arith.constant 0 : index
    %15 = vector.load %arg5[%c0_16, %c0_17] : memref<8x128xf32, #tpu.memory_space<vmem>>, vector<8x128xf32>
    %16 = vector.extract_strided_slice %15 {offsets = [0, 0], sizes = [8, 32], strides = [1, 1]} : vector<8x128xf32> to vector<8x32xf32>
    %cst_18 = arith.constant dense<0.000000e+00> : vector<8x384xf32>
    %17 = tpu.matmul %16, %12, %cst_18 {dimension_numbers = #tpu.dot_dimension_numbers<[1], [0], [0], [1], [0, 0, 1, 1], [], []>} : vector<8x32xf32>, vector<32x384xf32>, vector<8x384xf32> -> vector<8x384xf32>
    %18 = arith.addf %17, %13 : vector<8x384xf32>
    %19 = vector.extract_strided_slice %14 {offsets = [0, 0], sizes = [8, 128], strides = [1, 1]} : vector<8x384xf32> to vector<8x128xf32>
    %20 = vector.extract_strided_slice %18 {offsets = [0, 0], sizes = [8, 128], strides = [1, 1]} : vector<8x384xf32> to vector<8x128xf32>
    %21 = arith.addf %19, %20 : vector<8x128xf32>
    %22 = arith.negf %21 : vector<8x128xf32>
    %23 = math.exp %22 : vector<8x128xf32>
    %cst_19 = arith.constant 1.000000e+00 : f32
    %24 = vector.broadcast %cst_19 : f32 to vector<8x128xf32>
    %25 = arith.addf %24, %23 : vector<8x128xf32>
    %26 = arith.divf %24, %25 : vector<8x128xf32>
    %27 = vector.extract_strided_slice %14 {offsets = [0, 128], sizes = [8, 128], strides = [1, 1]} : vector<8x384xf32> to vector<8x128xf32>
    %28 = vector.extract_strided_slice %18 {offsets = [0, 128], sizes = [8, 128], strides = [1, 1]} : vector<8x384xf32> to vector<8x128xf32>
    %29 = arith.addf %27, %28 : vector<8x128xf32>
    %30 = arith.negf %29 : vector<8x128xf32>
    %31 = math.exp %30 : vector<8x128xf32>
    %cst_20 = arith.constant 1.000000e+00 : f32
    %32 = vector.broadcast %cst_20 : f32 to vector<8x128xf32>
    %33 = arith.addf %32, %31 : vector<8x128xf32>
    %34 = arith.divf %32, %33 : vector<8x128xf32>
    %35 = vector.extract_strided_slice %14 {offsets = [0, 256], sizes = [8, 128], strides = [1, 1]} : vector<8x384xf32> to vector<8x128xf32>
    %36 = vector.extract_strided_slice %18 {offsets = [0, 256], sizes = [8, 128], strides = [1, 1]} : vector<8x384xf32> to vector<8x128xf32>
    %37 = arith.mulf %26, %36 : vector<8x128xf32>
    %38 = arith.addf %35, %37 : vector<8x128xf32>
    %39 = math.tanh %38 : vector<8x128xf32>
    %cst_21 = arith.constant 1.000000e+00 : f32
    %40 = vector.broadcast %cst_21 : f32 to vector<8x128xf32>
    %41 = arith.subf %40, %34 : vector<8x128xf32>
    %42 = arith.mulf %41, %39 : vector<8x128xf32>
    %43 = arith.mulf %34, %15 : vector<8x128xf32>
    %44 = arith.addf %42, %43 : vector<8x128xf32>
    %c0_i32 = arith.constant 0 : i32
    %45 = vector.broadcast %c0_i32 : i32 to vector<8x1xi32>
    %46 = arith.cmpi sgt, %11, %45 : vector<8x1xi32>
    %47 = vector.shape_cast %46 : vector<8x1xi1> to vector<8x1xi1>
    %48 = vector.broadcast %47 : vector<8x1xi1> to vector<8x128xi1>
    %49 = arith.select %48, %44, %15 : vector<8x128xi1>, vector<8x128xf32>
    %c0_22 = arith.constant 0 : index
    %c0_23 = arith.constant 0 : index
    %50 = vector.load %arg5[%c0_22, %c0_23] : memref<8x128xf32, #tpu.memory_space<vmem>>, vector<8x128xf32>
    tpu.vector_store %arg5[%c0_22, %c0_23], %49 {strides = array<i32>} : memref<8x128xf32, #tpu.memory_space<vmem>>, vector<8x128xf32>,
    %c8 = arith.constant 8 : index
    %c0_24 = arith.constant 0 : index
    %51 = vector.load %arg6[%c8, %c0_24] : memref<64x384xf32, #tpu.memory_space<vmem>>, vector<8x384xf32>
    %c0_25 = arith.constant 0 : index
    %c0_26 = arith.constant 0 : index
    %52 = vector.load %arg5[%c0_25, %c0_26] : memref<8x128xf32, #tpu.memory_space<vmem>>, vector<8x128xf32>
    %53 = vector.extract_strided_slice %52 {offsets = [0, 0], sizes = [8, 32], strides = [1, 1]} : vector<8x128xf32> to vector<8x32xf32>
    %cst_27 = arith.constant dense<0.000000e+00> : vector<8x384xf32>
    %54 = tpu.matmul %53, %12, %cst_27 {dimension_numbers = #tpu.dot_dimension_numbers<[1], [0], [0], [1], [0, 0, 1, 1], [], []>} : vector<8x32xf32>, vector<32x384xf32>, vector<8x384xf32> -> vector<8x384xf32>
    %55 = arith.addf %54, %13 : vector<8x384xf32>
    %56 = vector.extract_strided_slice %51 {offsets = [0, 0], sizes = [8, 128], strides = [1, 1]} : vector<8x384xf32> to vector<8x128xf32>
    %57 = vector.extract_strided_slice %55 {offsets = [0, 0], sizes = [8, 128], strides = [1, 1]} : vector<8x384xf32> to vector<8x128xf32>
    %58 = arith.addf %56, %57 : vector<8x128xf32>
    %59 = arith.negf %58 : vector<8x128xf32>
    %60 = math.exp %59 : vector<8x128xf32>
    %cst_28 = arith.constant 1.000000e+00 : f32
    %61 = vector.broadcast %cst_28 : f32 to vector<8x128xf32>
    %62 = arith.addf %61, %60 : vector<8x128xf32>
    %63 = arith.divf %61, %62 : vector<8x128xf32>
    %64 = vector.extract_strided_slice %51 {offsets = [0, 128], sizes = [8, 128], strides = [1, 1]} : vector<8x384xf32> to vector<8x128xf32>
    %65 = vector.extract_strided_slice %55 {offsets = [0, 128], sizes = [8, 128], strides = [1, 1]} : vector<8x384xf32> to vector<8x128xf32>
    %66 = arith.addf %64, %65 : vector<8x128xf32>
    %67 = arith.negf %66 : vector<8x128xf32>
    %68 = math.exp %67 : vector<8x128xf32>
    %cst_29 = arith.constant 1.000000e+00 : f32
    %69 = vector.broadcast %cst_29 : f32 to vector<8x128xf32>
    %70 = arith.addf %69, %68 : vector<8x128xf32>
    %71 = arith.divf %69, %70 : vector<8x128xf32>
    %72 = vector.extract_strided_slice %51 {offsets = [0, 256], sizes = [8, 128], strides = [1, 1]} : vector<8x384xf32> to vector<8x128xf32>
    %73 = vector.extract_strided_slice %55 {offsets = [0, 256], sizes = [8, 128], strides = [1, 1]} : vector<8x384xf32> to vector<8x128xf32>
    %74 = arith.mulf %63, %73 : vector<8x128xf32>
    %75 = arith.addf %72, %74 : vector<8x128xf32>
    %76 = math.tanh %75 : vector<8x128xf32>
    %cst_30 = arith.constant 1.000000e+00 : f32
    %77 = vector.broadcast %cst_30 : f32 to vector<8x128xf32>
    %78 = arith.subf %77, %71 : vector<8x128xf32>
    %79 = arith.mulf %78, %76 : vector<8x128xf32>
    %80 = arith.mulf %71, %52 : vector<8x128xf32>
    %81 = arith.addf %79, %80 : vector<8x128xf32>
    %c1_i32 = arith.constant 1 : i32
    %82 = vector.broadcast %c1_i32 : i32 to vector<8x1xi32>
    %83 = arith.cmpi sgt, %11, %82 : vector<8x1xi32>
    %84 = vector.shape_cast %83 : vector<8x1xi1> to vector<8x1xi1>
    %85 = vector.broadcast %84 : vector<8x1xi1> to vector<8x128xi1>
    %86 = arith.select %85, %81, %52 : vector<8x128xi1>, vector<8x128xf32>
    %c0_31 = arith.constant 0 : index
    %c0_32 = arith.constant 0 : index
    %87 = vector.load %arg5[%c0_31, %c0_32] : memref<8x128xf32, #tpu.memory_space<vmem>>, vector<8x128xf32>
    tpu.vector_store %arg5[%c0_31, %c0_32], %86 {strides = array<i32>} : memref<8x128xf32, #tpu.memory_space<vmem>>, vector<8x128xf32>,
    %c16 = arith.constant 16 : index
    %c0_33 = arith.constant 0 : index
    %88 = vector.load %arg6[%c16, %c0_33] : memref<64x384xf32, #tpu.memory_space<vmem>>, vector<8x384xf32>
    %c0_34 = arith.constant 0 : index
    %c0_35 = arith.constant 0 : index
    %89 = vector.load %arg5[%c0_34, %c0_35] : memref<8x128xf32, #tpu.memory_space<vmem>>, vector<8x128xf32>
    %90 = vector.extract_strided_slice %89 {offsets = [0, 0], sizes = [8, 32], strides = [1, 1]} : vector<8x128xf32> to vector<8x32xf32>
    %cst_36 = arith.constant dense<0.000000e+00> : vector<8x384xf32>
    %91 = tpu.matmul %90, %12, %cst_36 {dimension_numbers = #tpu.dot_dimension_numbers<[1], [0], [0], [1], [0, 0, 1, 1], [], []>} : vector<8x32xf32>, vector<32x384xf32>, vector<8x384xf32> -> vector<8x384xf32>
    %92 = arith.addf %91, %13 : vector<8x384xf32>
    %93 = vector.extract_strided_slice %88 {offsets = [0, 0], sizes = [8, 128], strides = [1, 1]} : vector<8x384xf32> to vector<8x128xf32>
    %94 = vector.extract_strided_slice %92 {offsets = [0, 0], sizes = [8, 128], strides = [1, 1]} : vector<8x384xf32> to vector<8x128xf32>
    %95 = arith.addf %93, %94 : vector<8x128xf32>
    %96 = arith.negf %95 : vector<8x128xf32>
    %97 = math.exp %96 : vector<8x128xf32>
    %cst_37 = arith.constant 1.000000e+00 : f32
    %98 = vector.broadcast %cst_37 : f32 to vector<8x128xf32>
    %99 = arith.addf %98, %97 : vector<8x128xf32>
    %100 = arith.divf %98, %99 : vector<8x128xf32>
    %101 = vector.extract_strided_slice %88 {offsets = [0, 128], sizes = [8, 128], strides = [1, 1]} : vector<8x384xf32> to vector<8x128xf32>
    %102 = vector.extract_strided_slice %92 {offsets = [0, 128], sizes = [8, 128], strides = [1, 1]} : vector<8x384xf32> to vector<8x128xf32>
    %103 = arith.addf %101, %102 : vector<8x128xf32>
    %104 = arith.negf %103 : vector<8x128xf32>
    %105 = math.exp %104 : vector<8x128xf32>
    %cst_38 = arith.constant 1.000000e+00 : f32
    %106 = vector.broadcast %cst_38 : f32 to vector<8x128xf32>
    %107 = arith.addf %106, %105 : vector<8x128xf32>
    %108 = arith.divf %106, %107 : vector<8x128xf32>
    %109 = vector.extract_strided_slice %88 {offsets = [0, 256], sizes = [8, 128], strides = [1, 1]} : vector<8x384xf32> to vector<8x128xf32>
    %110 = vector.extract_strided_slice %92 {offsets = [0, 256], sizes = [8, 128], strides = [1, 1]} : vector<8x384xf32> to vector<8x128xf32>
    %111 = arith.mulf %100, %110 : vector<8x128xf32>
    %112 = arith.addf %109, %111 : vector<8x128xf32>
    %113 = math.tanh %112 : vector<8x128xf32>
    %cst_39 = arith.constant 1.000000e+00 : f32
    %114 = vector.broadcast %cst_39 : f32 to vector<8x128xf32>
    %115 = arith.subf %114, %108 : vector<8x128xf32>
    %116 = arith.mulf %115, %113 : vector<8x128xf32>
    %117 = arith.mulf %108, %89 : vector<8x128xf32>
    %118 = arith.addf %116, %117 : vector<8x128xf32>
    %c2_i32 = arith.constant 2 : i32
    %119 = vector.broadcast %c2_i32 : i32 to vector<8x1xi32>
    %120 = arith.cmpi sgt, %11, %119 : vector<8x1xi32>
    %121 = vector.shape_cast %120 : vector<8x1xi1> to vector<8x1xi1>
    %122 = vector.broadcast %121 : vector<8x1xi1> to vector<8x128xi1>
    %123 = arith.select %122, %118, %89 : vector<8x128xi1>, vector<8x128xf32>
    %c0_40 = arith.constant 0 : index
    %c0_41 = arith.constant 0 : index
    %124 = vector.load %arg5[%c0_40, %c0_41] : memref<8x128xf32, #tpu.memory_space<vmem>>, vector<8x128xf32>
    tpu.vector_store %arg5[%c0_40, %c0_41], %123 {strides = array<i32>} : memref<8x128xf32, #tpu.memory_space<vmem>>, vector<8x128xf32>,
    %c24 = arith.constant 24 : index
    %c0_42 = arith.constant 0 : index
    %125 = vector.load %arg6[%c24, %c0_42] : memref<64x384xf32, #tpu.memory_space<vmem>>, vector<8x384xf32>
    %c0_43 = arith.constant 0 : index
    %c0_44 = arith.constant 0 : index
    %126 = vector.load %arg5[%c0_43, %c0_44] : memref<8x128xf32, #tpu.memory_space<vmem>>, vector<8x128xf32>
    %127 = vector.extract_strided_slice %126 {offsets = [0, 0], sizes = [8, 32], strides = [1, 1]} : vector<8x128xf32> to vector<8x32xf32>
    %cst_45 = arith.constant dense<0.000000e+00> : vector<8x384xf32>
    %128 = tpu.matmul %127, %12, %cst_45 {dimension_numbers = #tpu.dot_dimension_numbers<[1], [0], [0], [1], [0, 0, 1, 1], [], []>} : vector<8x32xf32>, vector<32x384xf32>, vector<8x384xf32> -> vector<8x384xf32>
    %129 = arith.addf %128, %13 : vector<8x384xf32>
    %130 = vector.extract_strided_slice %125 {offsets = [0, 0], sizes = [8, 128], strides = [1, 1]} : vector<8x384xf32> to vector<8x128xf32>
    %131 = vector.extract_strided_slice %129 {offsets = [0, 0], sizes = [8, 128], strides = [1, 1]} : vector<8x384xf32> to vector<8x128xf32>
    %132 = arith.addf %130, %131 : vector<8x128xf32>
    %133 = arith.negf %132 : vector<8x128xf32>
    %134 = math.exp %133 : vector<8x128xf32>
    %cst_46 = arith.constant 1.000000e+00 : f32
    %135 = vector.broadcast %cst_46 : f32 to vector<8x128xf32>
    %136 = arith.addf %135, %134 : vector<8x128xf32>
    %137 = arith.divf %135, %136 : vector<8x128xf32>
    %138 = vector.extract_strided_slice %125 {offsets = [0, 128], sizes = [8, 128], strides = [1, 1]} : vector<8x384xf32> to vector<8x128xf32>
    %139 = vector.extract_strided_slice %129 {offsets = [0, 128], sizes = [8, 128], strides = [1, 1]} : vector<8x384xf32> to vector<8x128xf32>
    %140 = arith.addf %138, %139 : vector<8x128xf32>
    %141 = arith.negf %140 : vector<8x128xf32>
    %142 = math.exp %141 : vector<8x128xf32>
    %cst_47 = arith.constant 1.000000e+00 : f32
    %143 = vector.broadcast %cst_47 : f32 to vector<8x128xf32>
    %144 = arith.addf %143, %142 : vector<8x128xf32>
    %145 = arith.divf %143, %144 : vector<8x128xf32>
    %146 = vector.extract_strided_slice %125 {offsets = [0, 256], sizes = [8, 128], strides = [1, 1]} : vector<8x384xf32> to vector<8x128xf32>
    %147 = vector.extract_strided_slice %129 {offsets = [0, 256], sizes = [8, 128], strides = [1, 1]} : vector<8x384xf32> to vector<8x128xf32>
    %148 = arith.mulf %137, %147 : vector<8x128xf32>
    %149 = arith.addf %146, %148 : vector<8x128xf32>
    %150 = math.tanh %149 : vector<8x128xf32>
    %cst_48 = arith.constant 1.000000e+00 : f32
    %151 = vector.broadcast %cst_48 : f32 to vector<8x128xf32>
    %152 = arith.subf %151, %145 : vector<8x128xf32>
    %153 = arith.mulf %152, %150 : vector<8x128xf32>
    %154 = arith.mulf %145, %126 : vector<8x128xf32>
    %155 = arith.addf %153, %154 : vector<8x128xf32>
    %c3_i32 = arith.constant 3 : i32
    %156 = vector.broadcast %c3_i32 : i32 to vector<8x1xi32>
    %157 = arith.cmpi sgt, %11, %156 : vector<8x1xi32>
    %158 = vector.shape_cast %157 : vector<8x1xi1> to vector<8x1xi1>
    %159 = vector.broadcast %158 : vector<8x1xi1> to vector<8x128xi1>
    %160 = arith.select %159, %155, %126 : vector<8x128xi1>, vector<8x128xf32>
    %c0_49 = arith.constant 0 : index
    %c0_50 = arith.constant 0 : index
    %161 = vector.load %arg5[%c0_49, %c0_50] : memref<8x128xf32, #tpu.memory_space<vmem>>, vector<8x128xf32>
    tpu.vector_store %arg5[%c0_49, %c0_50], %160 {strides = array<i32>} : memref<8x128xf32, #tpu.memory_space<vmem>>, vector<8x128xf32>,
    %c32 = arith.constant 32 : index
    %c0_51 = arith.constant 0 : index
    %162 = vector.load %arg6[%c32, %c0_51] : memref<64x384xf32, #tpu.memory_space<vmem>>, vector<8x384xf32>
    %c0_52 = arith.constant 0 : index
    %c0_53 = arith.constant 0 : index
    %163 = vector.load %arg5[%c0_52, %c0_53] : memref<8x128xf32, #tpu.memory_space<vmem>>, vector<8x128xf32>
    %164 = vector.extract_strided_slice %163 {offsets = [0, 0], sizes = [8, 32], strides = [1, 1]} : vector<8x128xf32> to vector<8x32xf32>
    %cst_54 = arith.constant dense<0.000000e+00> : vector<8x384xf32>
    %165 = tpu.matmul %164, %12, %cst_54 {dimension_numbers = #tpu.dot_dimension_numbers<[1], [0], [0], [1], [0, 0, 1, 1], [], []>} : vector<8x32xf32>, vector<32x384xf32>, vector<8x384xf32> -> vector<8x384xf32>
    %166 = arith.addf %165, %13 : vector<8x384xf32>
    %167 = vector.extract_strided_slice %162 {offsets = [0, 0], sizes = [8, 128], strides = [1, 1]} : vector<8x384xf32> to vector<8x128xf32>
    %168 = vector.extract_strided_slice %166 {offsets = [0, 0], sizes = [8, 128], strides = [1, 1]} : vector<8x384xf32> to vector<8x128xf32>
    %169 = arith.addf %167, %168 : vector<8x128xf32>
    %170 = arith.negf %169 : vector<8x128xf32>
    %171 = math.exp %170 : vector<8x128xf32>
    %cst_55 = arith.constant 1.000000e+00 : f32
    %172 = vector.broadcast %cst_55 : f32 to vector<8x128xf32>
    %173 = arith.addf %172, %171 : vector<8x128xf32>
    %174 = arith.divf %172, %173 : vector<8x128xf32>
    %175 = vector.extract_strided_slice %162 {offsets = [0, 128], sizes = [8, 128], strides = [1, 1]} : vector<8x384xf32> to vector<8x128xf32>
    %176 = vector.extract_strided_slice %166 {offsets = [0, 128], sizes = [8, 128], strides = [1, 1]} : vector<8x384xf32> to vector<8x128xf32>
    %177 = arith.addf %175, %176 : vector<8x128xf32>
    %178 = arith.negf %177 : vector<8x128xf32>
    %179 = math.exp %178 : vector<8x128xf32>
    %cst_56 = arith.constant 1.000000e+00 : f32
    %180 = vector.broadcast %cst_56 : f32 to vector<8x128xf32>
    %181 = arith.addf %180, %179 : vector<8x128xf32>
    %182 = arith.divf %180, %181 : vector<8x128xf32>
    %183 = vector.extract_strided_slice %162 {offsets = [0, 256], sizes = [8, 128], strides = [1, 1]} : vector<8x384xf32> to vector<8x128xf32>
    %184 = vector.extract_strided_slice %166 {offsets = [0, 256], sizes = [8, 128], strides = [1, 1]} : vector<8x384xf32> to vector<8x128xf32>
    %185 = arith.mulf %174, %184 : vector<8x128xf32>
    %186 = arith.addf %183, %185 : vector<8x128xf32>
    %187 = math.tanh %186 : vector<8x128xf32>
    %cst_57 = arith.constant 1.000000e+00 : f32
    %188 = vector.broadcast %cst_57 : f32 to vector<8x128xf32>
    %189 = arith.subf %188, %182 : vector<8x128xf32>
    %190 = arith.mulf %189, %187 : vector<8x128xf32>
    %191 = arith.mulf %182, %163 : vector<8x128xf32>
    %192 = arith.addf %190, %191 : vector<8x128xf32>
    %c4_i32 = arith.constant 4 : i32
    %193 = vector.broadcast %c4_i32 : i32 to vector<8x1xi32>
    %194 = arith.cmpi sgt, %11, %193 : vector<8x1xi32>
    %195 = vector.shape_cast %194 : vector<8x1xi1> to vector<8x1xi1>
    %196 = vector.broadcast %195 : vector<8x1xi1> to vector<8x128xi1>
    %197 = arith.select %196, %192, %163 : vector<8x128xi1>, vector<8x128xf32>
    %c0_58 = arith.constant 0 : index
    %c0_59 = arith.constant 0 : index
    %198 = vector.load %arg5[%c0_58, %c0_59] : memref<8x128xf32, #tpu.memory_space<vmem>>, vector<8x128xf32>
    tpu.vector_store %arg5[%c0_58, %c0_59], %197 {strides = array<i32>} : memref<8x128xf32, #tpu.memory_space<vmem>>, vector<8x128xf32>,
    %c40 = arith.constant 40 : index
    %c0_60 = arith.constant 0 : index
    %199 = vector.load %arg6[%c40, %c0_60] : memref<64x384xf32, #tpu.memory_space<vmem>>, vector<8x384xf32>
    %c0_61 = arith.constant 0 : index
    %c0_62 = arith.constant 0 : index
    %200 = vector.load %arg5[%c0_61, %c0_62] : memref<8x128xf32, #tpu.memory_space<vmem>>, vector<8x128xf32>
    %201 = vector.extract_strided_slice %200 {offsets = [0, 0], sizes = [8, 32], strides = [1, 1]} : vector<8x128xf32> to vector<8x32xf32>
    %cst_63 = arith.constant dense<0.000000e+00> : vector<8x384xf32>
    %202 = tpu.matmul %201, %12, %cst_63 {dimension_numbers = #tpu.dot_dimension_numbers<[1], [0], [0], [1], [0, 0, 1, 1], [], []>} : vector<8x32xf32>, vector<32x384xf32>, vector<8x384xf32> -> vector<8x384xf32>
    %203 = arith.addf %202, %13 : vector<8x384xf32>
    %204 = vector.extract_strided_slice %199 {offsets = [0, 0], sizes = [8, 128], strides = [1, 1]} : vector<8x384xf32> to vector<8x128xf32>
    %205 = vector.extract_strided_slice %203 {offsets = [0, 0], sizes = [8, 128], strides = [1, 1]} : vector<8x384xf32> to vector<8x128xf32>
    %206 = arith.addf %204, %205 : vector<8x128xf32>
    %207 = arith.negf %206 : vector<8x128xf32>
    %208 = math.exp %207 : vector<8x128xf32>
    %cst_64 = arith.constant 1.000000e+00 : f32
    %209 = vector.broadcast %cst_64 : f32 to vector<8x128xf32>
    %210 = arith.addf %209, %208 : vector<8x128xf32>
    %211 = arith.divf %209, %210 : vector<8x128xf32>
    %212 = vector.extract_strided_slice %199 {offsets = [0, 128], sizes = [8, 128], strides = [1, 1]} : vector<8x384xf32> to vector<8x128xf32>
    %213 = vector.extract_strided_slice %203 {offsets = [0, 128], sizes = [8, 128], strides = [1, 1]} : vector<8x384xf32> to vector<8x128xf32>
    %214 = arith.addf %212, %213 : vector<8x128xf32>
    %215 = arith.negf %214 : vector<8x128xf32>
    %216 = math.exp %215 : vector<8x128xf32>
    %cst_65 = arith.constant 1.000000e+00 : f32
    %217 = vector.broadcast %cst_65 : f32 to vector<8x128xf32>
    %218 = arith.addf %217, %216 : vector<8x128xf32>
    %219 = arith.divf %217, %218 : vector<8x128xf32>
    %220 = vector.extract_strided_slice %199 {offsets = [0, 256], sizes = [8, 128], strides = [1, 1]} : vector<8x384xf32> to vector<8x128xf32>
    %221 = vector.extract_strided_slice %203 {offsets = [0, 256], sizes = [8, 128], strides = [1, 1]} : vector<8x384xf32> to vector<8x128xf32>
    %222 = arith.mulf %211, %221 : vector<8x128xf32>
    %223 = arith.addf %220, %222 : vector<8x128xf32>
    %224 = math.tanh %223 : vector<8x128xf32>
    %cst_66 = arith.constant 1.000000e+00 : f32
    %225 = vector.broadcast %cst_66 : f32 to vector<8x128xf32>
    %226 = arith.subf %225, %219 : vector<8x128xf32>
    %227 = arith.mulf %226, %224 : vector<8x128xf32>
    %228 = arith.mulf %219, %200 : vector<8x128xf32>
    %229 = arith.addf %227, %228 : vector<8x128xf32>
    %c5_i32 = arith.constant 5 : i32
    %230 = vector.broadcast %c5_i32 : i32 to vector<8x1xi32>
    %231 = arith.cmpi sgt, %11, %230 : vector<8x1xi32>
    %232 = vector.shape_cast %231 : vector<8x1xi1> to vector<8x1xi1>
    %233 = vector.broadcast %232 : vector<8x1xi1> to vector<8x128xi1>
    %234 = arith.select %233, %229, %200 : vector<8x128xi1>, vector<8x128xf32>
    %c0_67 = arith.constant 0 : index
    %c0_68 = arith.constant 0 : index
    %235 = vector.load %arg5[%c0_67, %c0_68] : memref<8x128xf32, #tpu.memory_space<vmem>>, vector<8x128xf32>
    tpu.vector_store %arg5[%c0_67, %c0_68], %234 {strides = array<i32>} : memref<8x128xf32, #tpu.memory_space<vmem>>, vector<8x128xf32>,
    %c48 = arith.constant 48 : index
    %c0_69 = arith.constant 0 : index
    %236 = vector.load %arg6[%c48, %c0_69] : memref<64x384xf32, #tpu.memory_space<vmem>>, vector<8x384xf32>
    %c0_70 = arith.constant 0 : index
    %c0_71 = arith.constant 0 : index
    %237 = vector.load %arg5[%c0_70, %c0_71] : memref<8x128xf32, #tpu.memory_space<vmem>>, vector<8x128xf32>
    %238 = vector.extract_strided_slice %237 {offsets = [0, 0], sizes = [8, 32], strides = [1, 1]} : vector<8x128xf32> to vector<8x32xf32>
    %cst_72 = arith.constant dense<0.000000e+00> : vector<8x384xf32>
    %239 = tpu.matmul %238, %12, %cst_72 {dimension_numbers = #tpu.dot_dimension_numbers<[1], [0], [0], [1], [0, 0, 1, 1], [], []>} : vector<8x32xf32>, vector<32x384xf32>, vector<8x384xf32> -> vector<8x384xf32>
    %240 = arith.addf %239, %13 : vector<8x384xf32>
    %241 = vector.extract_strided_slice %236 {offsets = [0, 0], sizes = [8, 128], strides = [1, 1]} : vector<8x384xf32> to vector<8x128xf32>
    %242 = vector.extract_strided_slice %240 {offsets = [0, 0], sizes = [8, 128], strides = [1, 1]} : vector<8x384xf32> to vector<8x128xf32>
    %243 = arith.addf %241, %242 : vector<8x128xf32>
    %244 = arith.negf %243 : vector<8x128xf32>
    %245 = math.exp %244 : vector<8x128xf32>
    %cst_73 = arith.constant 1.000000e+00 : f32
    %246 = vector.broadcast %cst_73 : f32 to vector<8x128xf32>
    %247 = arith.addf %246, %245 : vector<8x128xf32>
    %248 = arith.divf %246, %247 : vector<8x128xf32>
    %249 = vector.extract_strided_slice %236 {offsets = [0, 128], sizes = [8, 128], strides = [1, 1]} : vector<8x384xf32> to vector<8x128xf32>
    %250 = vector.extract_strided_slice %240 {offsets = [0, 128], sizes = [8, 128], strides = [1, 1]} : vector<8x384xf32> to vector<8x128xf32>
    %251 = arith.addf %249, %250 : vector<8x128xf32>
    %252 = arith.negf %251 : vector<8x128xf32>
    %253 = math.exp %252 : vector<8x128xf32>
    %cst_74 = arith.constant 1.000000e+00 : f32
    %254 = vector.broadcast %cst_74 : f32 to vector<8x128xf32>
    %255 = arith.addf %254, %253 : vector<8x128xf32>
    %256 = arith.divf %254, %255 : vector<8x128xf32>
    %257 = vector.extract_strided_slice %236 {offsets = [0, 256], sizes = [8, 128], strides = [1, 1]} : vector<8x384xf32> to vector<8x128xf32>
    %258 = vector.extract_strided_slice %240 {offsets = [0, 256], sizes = [8, 128], strides = [1, 1]} : vector<8x384xf32> to vector<8x128xf32>
    %259 = arith.mulf %248, %258 : vector<8x128xf32>
    %260 = arith.addf %257, %259 : vector<8x128xf32>
    %261 = math.tanh %260 : vector<8x128xf32>
    %cst_75 = arith.constant 1.000000e+00 : f32
    %262 = vector.broadcast %cst_75 : f32 to vector<8x128xf32>
    %263 = arith.subf %262, %256 : vector<8x128xf32>
    %264 = arith.mulf %263, %261 : vector<8x128xf32>
    %265 = arith.mulf %256, %237 : vector<8x128xf32>
    %266 = arith.addf %264, %265 : vector<8x128xf32>
    %c6_i32 = arith.constant 6 : i32
    %267 = vector.broadcast %c6_i32 : i32 to vector<8x1xi32>
    %268 = arith.cmpi sgt, %11, %267 : vector<8x1xi32>
    %269 = vector.shape_cast %268 : vector<8x1xi1> to vector<8x1xi1>
    %270 = vector.broadcast %269 : vector<8x1xi1> to vector<8x128xi1>
    %271 = arith.select %270, %266, %237 : vector<8x128xi1>, vector<8x128xf32>
    %c0_76 = arith.constant 0 : index
    %c0_77 = arith.constant 0 : index
    %272 = vector.load %arg5[%c0_76, %c0_77] : memref<8x128xf32, #tpu.memory_space<vmem>>, vector<8x128xf32>
    tpu.vector_store %arg5[%c0_76, %c0_77], %271 {strides = array<i32>} : memref<8x128xf32, #tpu.memory_space<vmem>>, vector<8x128xf32>,
    %c56 = arith.constant 56 : index
    %c0_78 = arith.constant 0 : index
    %273 = vector.load %arg6[%c56, %c0_78] : memref<64x384xf32, #tpu.memory_space<vmem>>, vector<8x384xf32>
    %c0_79 = arith.constant 0 : index
    %c0_80 = arith.constant 0 : index
    %274 = vector.load %arg5[%c0_79, %c0_80] : memref<8x128xf32, #tpu.memory_space<vmem>>, vector<8x128xf32>
    %275 = vector.extract_strided_slice %274 {offsets = [0, 0], sizes = [8, 32], strides = [1, 1]} : vector<8x128xf32> to vector<8x32xf32>
    %cst_81 = arith.constant dense<0.000000e+00> : vector<8x384xf32>
    %276 = tpu.matmul %275, %12, %cst_81 {dimension_numbers = #tpu.dot_dimension_numbers<[1], [0], [0], [1], [0, 0, 1, 1], [], []>} : vector<8x32xf32>, vector<32x384xf32>, vector<8x384xf32> -> vector<8x384xf32>
    %277 = arith.addf %276, %13 : vector<8x384xf32>
    %278 = vector.extract_strided_slice %273 {offsets = [0, 0], sizes = [8, 128], strides = [1, 1]} : vector<8x384xf32> to vector<8x128xf32>
    %279 = vector.extract_strided_slice %277 {offsets = [0, 0], sizes = [8, 128], strides = [1, 1]} : vector<8x384xf32> to vector<8x128xf32>
    %280 = arith.addf %278, %279 : vector<8x128xf32>
    %281 = arith.negf %280 : vector<8x128xf32>
    %282 = math.exp %281 : vector<8x128xf32>
    %cst_82 = arith.constant 1.000000e+00 : f32
    %283 = vector.broadcast %cst_82 : f32 to vector<8x128xf32>
    %284 = arith.addf %283, %282 : vector<8x128xf32>
    %285 = arith.divf %283, %284 : vector<8x128xf32>
    %286 = vector.extract_strided_slice %273 {offsets = [0, 128], sizes = [8, 128], strides = [1, 1]} : vector<8x384xf32> to vector<8x128xf32>
    %287 = vector.extract_strided_slice %277 {offsets = [0, 128], sizes = [8, 128], strides = [1, 1]} : vector<8x384xf32> to vector<8x128xf32>
    %288 = arith.addf %286, %287 : vector<8x128xf32>
    %289 = arith.negf %288 : vector<8x128xf32>
    %290 = math.exp %289 : vector<8x128xf32>
    %cst_83 = arith.constant 1.000000e+00 : f32
    %291 = vector.broadcast %cst_83 : f32 to vector<8x128xf32>
    %292 = arith.addf %291, %290 : vector<8x128xf32>
    %293 = arith.divf %291, %292 : vector<8x128xf32>
    %294 = vector.extract_strided_slice %273 {offsets = [0, 256], sizes = [8, 128], strides = [1, 1]} : vector<8x384xf32> to vector<8x128xf32>
    %295 = vector.extract_strided_slice %277 {offsets = [0, 256], sizes = [8, 128], strides = [1, 1]} : vector<8x384xf32> to vector<8x128xf32>
    %296 = arith.mulf %285, %295 : vector<8x128xf32>
    %297 = arith.addf %294, %296 : vector<8x128xf32>
    %298 = math.tanh %297 : vector<8x128xf32>
    %cst_84 = arith.constant 1.000000e+00 : f32
    %299 = vector.broadcast %cst_84 : f32 to vector<8x128xf32>
    %300 = arith.subf %299, %293 : vector<8x128xf32>
    %301 = arith.mulf %300, %298 : vector<8x128xf32>
    %302 = arith.mulf %293, %274 : vector<8x128xf32>
    %303 = arith.addf %301, %302 : vector<8x128xf32>
    %c7_i32 = arith.constant 7 : i32
    %304 = vector.broadcast %c7_i32 : i32 to vector<8x1xi32>
    %305 = arith.cmpi sgt, %11, %304 : vector<8x1xi32>
    %306 = vector.shape_cast %305 : vector<8x1xi1> to vector<8x1xi1>
    %307 = vector.broadcast %306 : vector<8x1xi1> to vector<8x128xi1>
    %308 = arith.select %307, %303, %274 : vector<8x128xi1>, vector<8x128xf32>
    %c0_85 = arith.constant 0 : index
    %c0_86 = arith.constant 0 : index
    %309 = vector.load %arg5[%c0_85, %c0_86] : memref<8x128xf32, #tpu.memory_space<vmem>>, vector<8x128xf32>
    tpu.vector_store %arg5[%c0_85, %c0_86], %308 {strides = array<i32>} : memref<8x128xf32, #tpu.memory_space<vmem>>, vector<8x128xf32>,
    return
  }
}

</mosaic_0001>

<bundles_post_ra>
// kernel: tpu_custom_call.1
= control target key start
LH: loop header
LB: loop body
LE: loop exit
PB: predicated region body
PF: predicated region fallthrough
CT: control target
= control target key end

     0   :  { %10 = vsyncpa [#allocation4], 0  ;;  %s2650_s0 = inlined_call_operand.vmem [shape: s32[8,1], index: 0, kind: input, shape index: {}]   ;;  %s2651_s1 = inlined_call_operand.vmem [shape: s32[64,1], index: 1, kind: input, shape index: {}]   ;;  %s2652_s2 = inlined_call_operand.vmem [shape: f32[16,384], index: 2, kind: input, shape index: {}]   ;;  %s2653_s3 = inlined_call_operand.hbm [shape: f32[32,384], index: 3, kind: input, shape index: {}]   ;;  %s2654_s4 = inlined_call_operand.vmem [shape: f32[8,384], index: 4, kind: input, shape index: {}]   ;;  %s2655_s5 = inlined_call_operand.hbm [shape: f32[8,128], index: 5, kind: output, shape index: {}]  }
   0x1   :  { %11 = vsyncpa [#allocation5], 0  ;;  %s2317_s18 = smov [#allocation3]   ;;  %s2269_s22 = scalar_lea.hbm %s2653_s3, 1536 }
   0x2   :  { %s23_s19 = sshll.u32 %s2317_s18, 4  ;;  %p2270_p0 = scmp.ne.s32.totalorder %s2653_s3, %s2269_s22  ;;  %s24_s19 = int_to_ptr.vmem [resolvable:$true] %s23_s19 }
   0x3   :  { %p2273_p1 = scmp.lt.u32.totalorder %s2269_s22, %s2653_s3 }
   0x5   :  { %p2275_p2 = pnand %p2273_p1, %p2270_p0 }
   0x7   :  { %2278 = shalt.err (!%p2275_p2)
}
   0x8   :  { %s2279_s27 = scalar_lea.vmem %s24_s19, 1536  ;;  %p2284_p4 = scmp.lt.s32.totalorder %s24_s19, %s24_s19 }
   0x9   :  { %p2280_p3 = scmp.ne.s32.totalorder %s24_s19, %s2279_s27  ;;  %p2285_p5 = scmp.lt.s32.totalorder %s2279_s27, %s2279_s27 }
   0xb   :  { %p2286_p6 = por %p2285_p5, %p2284_p4 }
   0xd   :  { %p2287_p7 = pnand %p2286_p6, %p2280_p3 }
   0xf   :  { %2290 = shalt.err (!%p2287_p7)
}
  0x10   :  { %s2318_s28 = smov 384   ;;  %s2319_s29 = smov 24  }
  0x11   :  { %29 = dma.hbm_to_vmem [thread:$0]  %s2653_s3, 1536, %s24_s19, [#allocation4], %s2318_s28, %s2318_s28, %s2319_s29  }
  0x12   :  { %2313 = dma.done.wait [#allocation4], 1536  }
  0x13   :  { %2314 = vsyncadd [#allocation4], 4294965760  ;;  %v2320_v0 = vmov 0   ;;  %v2321_v1 = vmov 0.0   ;;  %v38_v2 = vld [vmem:[%s2651_s1 + $0x10] sm:$0xff]  ;;  %v36_v3 = vld [vmem:[%s2651_s1] sm:$0xff]  ;;  %v44_v31 = vlaneseq }
  0x14   :  { %2188 = vset.pattern.permute.xlu1 %v2320_v0  ;;  %2187 = vset.pattern.permute.xlu0 %v2320_v0  ;;  %v39_v4 = vld [vmem:[%s2651_s1 + $0x18] sm:$0xff]  ;;  %v37_v5 = vld [vmem:[%s2651_s1 + $0x8] sm:$0xff]  ;;  %v98_v7 = vld [vmem:[%s2652_s2 + $0x20] sm:$0xff]  ;;  %vm100_vm8 = vcmask 130048   ;;  %v2322_v57 = vmov 0.0|0.0  }
  0x15   :  { %189 = vmatprep.mubr.f32.mxu0 %v2321_v1  ;;  %225 = vmatprep.mubr.f32.mxu1 %v2321_v1  ;;  %v95_v6 = vld [vmem:[%s2652_s2 + $0x8] sm:$0xff]  ;;  %v94_v8 = vld [vmem:[%s2652_s2] sm:$0xff]  ;;  %v97_v9 = vld [vmem:[%s2652_s2 + $0x18] sm:$0xff]  ;;  %v45_v32 = vand.u32 127, %v44_v31 }
  0x16   :  { %53 = vperm.xlu1 %2188, %v38_v2   ;;  %47 = vperm.xlu0 %2187, %v36_v3   ;;  %v369_v10 = vld [vmem:[#allocation3 + $0x8] sm:$0xff]  ;;  %v372_v11 = vld [vmem:[#allocation3 + $0x20] sm:$0xff]  ;;  %v41_v12 = vld [vmem:[%s2651_s1 + $0x28] sm:$0xff]  ;;  %v2025_v14 = vpack.c.bf16 %v98_v7, %v95_v6  ;;  %v2027_v15 = vpack.c.bf16 %v97_v9, %v94_v8 }
  0x17   :  { %v40_v13 = vld [vmem:[%s2651_s1 + $0x20] sm:$0xff]  ;;  %v2402_v17 = vpack.c.bf16 %v372_v11, %v369_v10  ;;  %v43_v18 = vld [vmem:[%s2651_s1 + $0x38] sm:$0xff]  ;;  %v42_v19 = vld [vmem:[%s2651_s1 + $0x30] sm:$0xff] }
  0x18   :  { %v367_v16 = vld [vmem:[%s2650_s0] sm:$0xff]  ;;  %2026 = vmatprep.subr.bf16.mxu0 %v2025_v14  ;;  %2145 = vmatprep.subr.bf16.mxu1 %v2025_v14  ;;  %v96_v22 = vld [vmem:[%s2652_s2 + $0x10] sm:$0xff]  ;;  %v99_v23 = vld [vmem:[%s2652_s2 + $0x28] sm:$0xff] }
  0x19   :  { %vm730_vm0 = vcmp.gt.s32.totalorder %v367_v16, 1  ;;  %vm553_vm1 = vcmp.gt.s32.totalorder %v367_v16, 0  ;;  %2028 = vmatpush1.bf16.msra.mxu0 %v2027_v15  ;;  %2146 = vmatpush1.bf16.msra.mxu1 %v2027_v15  ;;  %vm1084_vm2 = vcmp.gt.s32.totalorder %v367_v16, 3  ;;  %vm907_vm3 = vcmp.gt.s32.totalorder %v367_v16, 2  ;;  %v368_v33 = vld [vmem:[#allocation3] sm:$0xff]  ;;  %v371_v34 = vld [vmem:[#allocation3 + $0x18] sm:$0xff] }
  0x1a   :  { %56 = vperm.xlu1 %2188, %v39_v4   ;;  %50 = vperm.xlu0 %2187, %v37_v5   ;;  %v731_v20 = vsel %vm730_vm0, 1, %v2320_v0  ;;  %v554_v21 = vsel %vm553_vm1, 1, %v2320_v0  ;;  %v2417_v24 = vpack.c.bf16 %v99_v23, %v96_v22  ;;  %v1085_v25 = vsel %vm1084_vm2, 1, %v2320_v0  ;;  %v375_v35 = vld [vmem:[#allocation3 + $0x38] sm:$0xff]  ;;  %v378_v36 = vld [vmem:[#allocation3 + $0x50] sm:$0xff]  ;;  %v377_v42 = vld [vmem:[#allocation3 + $0x48] sm:$0xff] }
  0x1b   :  { %2034 = vmatprep.subr.bf16.mxu0 %v2402_v17  ;;  %v908_v26 = vsel %vm907_vm3, 1, %v2320_v0  ;;  %vm1438_vm4 = vcmp.gt.s32.totalorder %v367_v16, 5  ;;  %vm1261_vm5 = vcmp.gt.s32.totalorder %v367_v16, 4  ;;  %vm1792_vm6 = vcmp.gt.s32.totalorder %v367_v16, 7  ;;  %v374_v41 = vld [vmem:[#allocation3 + $0x30] sm:$0xff]  ;;  %v373_v59 = vld [vmem:[#allocation3 + $0x28] sm:$0xff] }
  0x1c   :  { %2030 = vmatprep.subr.bf16.mxu1 %v2417_v24  ;;  %v1439_v27 = vsel %vm1438_vm4, 1, %v2320_v0  ;;  %v1262_v28 = vsel %vm1261_vm5, 1, %v2320_v0  ;;  %vm1615_vm7 = vcmp.gt.s32.totalorder %v367_v16, 6  ;;  %v1793_v29 = vsel %vm1792_vm6, 1, %v2320_v0  ;;  %v370_v58 = vld [vmem:[#allocation3 + $0x10] sm:$0xff]  ;;  %v376_v62 = vld [vmem:[#allocation3 + $0x40] sm:$0xff] }
  0x1d   :  { %v1616_v30 = vsel %vm1615_vm7, 1, %v2320_v0  ;;  %v2420_v39 = vpack.c.bf16 %v371_v34, %v368_v33  ;;  %v2422_v40 = vpack.c.bf16 %v378_v36, %v375_v35  ;;  %v2428_v46 = vpack.c.bf16 %v377_v42, %v374_v41  ;;  %v379_v63 = vld [vmem:[#allocation3 + $0x58] sm:$0xff]  ;;  %v2501_v8 = vld [vmem:[%s2654_s4] sm:$0xff]  ;;  %v2511_v14 = vld [vmem:[%s2654_s4 + $0x8] sm:$0xff] }
  0x1e   :  { %62 = vperm.xlu1 %2188, %v41_v12   ;;  %59 = vperm.xlu0 %2187, %v40_v13   ;;  %v2453_v60 = vpack.c.bf16 %v373_v59, %v370_v58  ;;  %vm387_vm1 = vcmask 261120   ;;  %v2461_v0 = vpack.c.bf16 %v379_v63, %v376_v62  ;;  %vm2323_vm2 = vmmov 0  }
  0x22   :  { %68 = vperm.xlu1 %2188, %v43_v18   ;;  %65 = vperm.xlu0 %2187, %v42_v19  }
  0x26   :  { %733 = vperm.xlu1 %2188, %v731_v20   ;;  %556 = vperm.xlu0 %2187, %v554_v21  }
  0x2a   :  { %1087 = vperm.xlu1 %2188, %v1085_v25   ;;  %910 = vperm.xlu0 %2187, %v908_v26  }
  0x2e   :  { %1441 = vperm.xlu1 %2188, %v1439_v27   ;;  %1264 = vperm.xlu0 %2187, %v1262_v28   ;;  %v2525_v28 = vld [vmem:[%s2654_s4 + $0x10] sm:$0xff]  ;;  %s2324_s4 = smov [#allocation6]  }
  0x2f   :  { %s1806_s13 = sshll.u32 %s2324_s4, 4  ;;  %s1807_s13 = int_to_ptr.vmem [resolvable:$true] %s1806_s13 }
  0x30   :  { %s2291_s14 = scalar_lea.vmem %s1807_s13, 128  ;;  %p2296_p9 = scmp.lt.s32.totalorder %s1807_s13, %s1807_s13 }
  0x31   :  { %p2292_p8 = scmp.ne.s32.totalorder %s1807_s13, %s2291_s14  ;;  %p2297_p10 = scmp.lt.s32.totalorder %s2291_s14, %s2291_s14 }
  0x32   :  { %1795 = vperm.xlu1 %2188, %v1793_v29   ;;  %1618 = vperm.xlu0 %2187, %v1616_v30  }
  0x33   :  { %p2298_p11 = por %p2297_p10, %p2296_p9 }
  0x35   :  { %p2299_p12 = pnand %p2298_p11, %p2292_p8 }
  0x95   :  { %v54_v37 = vpop.permute.xlu1 %53  ;;  %v48_v38 = vpop.permute.xlu0 %47 }
  0x96   :  { %vm70_vm9 = vcmp.eq.s32.totalorder %v48_v38, %v45_v32  ;;  %vm72_vm10 = vcmp.eq.s32.totalorder %v54_v37, %v45_v32 }
  0x97   :  { %v1815_v43 = vsel %vm70_vm9, 1.0, %v2321_v1  ;;  %v1817_v48 = vsel %vm72_vm10, 1.0, %v2321_v1 }
  0x98   :  { %1823 = vmatmul.mubr.msk.f32.vlgmr.msra.gmra.mrb[0].mxu0 %vm100_vm8, %v1815_v43 }
  0x99   :  { %2036 = vmatpush1.bf16.msra.mxu0 %v2420_v39  ;;  %v57_v44 = vpop.permute.xlu1 %56  ;;  %v51_v45 = vpop.permute.xlu0 %50  ;;  %195 = vmatprep.mubr.f32.mxu0 %v2321_v1 }
  0x9a   :  { %vm71_vm11 = vcmp.eq.s32.totalorder %v51_v45, %v45_v32  ;;  %2038 = vmatprep.subr.bf16.mxu0 %v2422_v40  ;;  %vm73_vm12 = vcmp.eq.s32.totalorder %v57_v44, %v45_v32 }
  0x9b   :  { %v1816_v47 = vsel %vm71_vm11, 1.0, %v2321_v1  ;;  %v1818_v53 = vsel %vm73_vm12, 1.0, %v2321_v1 }
  0x9c   :  { %1824 = vmatmul.mubr.msk.f32.gmra.mrb[2].mxu0 %vm100_vm8, %v1816_v47 }
  0x9d   :  { %v63_v49 = vpop.permute.xlu1 %62  ;;  %v60_v50 = vpop.permute.xlu0 %59  ;;  %201 = vmatprep.mubr.f32.mxu0 %v2321_v1  ;;  %2040 = vmatpush1.bf16.msra.mxu0 %v2428_v46 }
  0x9e   :  { %2048 = vmatprep.subr.bf16.mxu0 %v2402_v17  ;;  %vm74_vm14 = vcmp.eq.s32.totalorder %v60_v50, %v45_v32  ;;  %vm75_vm0 = vcmp.eq.s32.totalorder %v63_v49, %v45_v32 }
  0x9f   :  { %v1819_v55 = vsel %vm74_vm14, 1.0, %v2321_v1  ;;  %v1820_v61 = vsel %vm75_vm0, 1.0, %v2321_v1 }
  0xa0   :  { %1825 = vmatmul.mubr.msk.f32.gmra.mrb[4].mxu0 %vm100_vm8, %v1817_v48 }
  0xa1   :  { %v69_v51 = vpop.permute.xlu1 %68  ;;  %v66_v52 = vpop.permute.xlu0 %65  ;;  %207 = vmatprep.mubr.f32.mxu0 %v2321_v1 }
  0xa2   :  { %vm76_vm13 = vcmp.eq.s32.totalorder %v66_v52, %v45_v32  ;;  %vm77_vm15 = vcmp.eq.s32.totalorder %v69_v51, %v45_v32 }
  0xa3   :  { %v1821_v54 = vsel %vm76_vm13, 1.0, %v2321_v1  ;;  %v1822_v56 = vsel %vm77_vm15, 1.0, %v2321_v1 }
  0xa4   :  { %1826 = vmatmul.mubr.msk.f32.gmra.mrb[6].mxu0 %vm100_vm8, %v1818_v53  ;;  %1829 = vmatmul.mubr.msk.f32.vlgmr.msra.gmra.mrb[0].mxu1 %vm100_vm8, %v1821_v54 }
  0xa5   :  { %213 = vmatprep.mubr.f32.mxu0 %v2321_v1  ;;  %231 = vmatprep.mubr.f32.mxu1 %v2321_v1  ;;  %v557_v37 = vpop.permute.xlu0 %556 }
  0xa6   :  { %2032 = vmatpush3.bf16.msra.mxu1 %v2417_v24  ;;  %vm558_vm3 = vcmp.eq.s32.totalorder %v557_v37, 1 }
  0xa7   :  { %2041 = vmatprep.subr.bf16.mxu1 %v2322_v57 }
  0xa8   :  { %1827 = vmatmul.mubr.msk.f32.gmra.mrb[8].mxu0 %vm100_vm8, %v1819_v55  ;;  %1830 = vmatmul.mubr.msk.f32.gmra.mrb[2].mxu1 %vm100_vm8, %v1822_v56 }
  0xa9   :  { %1925 = vmatprep.mubr.msk.f32.mxu1 %vm100_vm8, %v1815_v43  ;;  %219 = vmatprep.mubr.f32.mxu0 %v2321_v1 }
  0xac   :  { %1828 = vmatmul.mubr.msk.f32.gmra.mrb[10].mxu0 %vm100_vm8, %v1820_v61  ;;  %1926 = vmatmul.mubr.msk.f32.vlgmr.msra.gmra.mrb[4].mxu1 %vm100_vm8, %v1816_v47 }
  0xad   :  { %1928 = vmatprep.mubr.msk.f32.mxu1 %vm100_vm8, %v1817_v48  ;;  %455 = vmatprep.mubr.f32.mxu0 %v2321_v1 }
  0xae   :  { %2043 = vmatpush3.bf16.msra.mxu1 %v2453_v60 }
  0xaf   :  { %2044 = vmatprep.subr.bf16.mxu1 %v2322_v57 }
  0xb0   :  { %1929 = vmatmul.mubr.msk.f32.gmra.mrb[6].mxu1 %vm100_vm8, %v1818_v53  ;;  %1839 = vmatmul.mubr.msk.f32.vlgmr.msra.gmra.mrb[0].mxu0 %vm387_vm1, %v2321_v1 }
  0xb1   :  { %1931 = vmatprep.mubr.msk.f32.mxu1 %vm100_vm8, %v1819_v55  ;;  %2050 = vmatpush1.bf16.msra.mxu0 %v2420_v39 }
  0xb2   :  { %2046 = vmatpush3.bf16.msra.mxu1 %v2461_v0  ;;  %2052 = vmatprep.subr.bf16.mxu0 %v2422_v40 }
  0xb3   :  { %2055 = vmatprep.subr.bf16.mxu1 %v2322_v57  ;;  %632 = vmatprep.mubr.f32.mxu0 %v2321_v1 }
  0xb4   :  { %1932 = vmatmul.mubr.msk.f32.gmra.mrb[8].mxu1 %vm100_vm8, %v1820_v61 }
  0xb5   :  { %1934 = vmatprep.mubr.msk.f32.mxu1 %vm100_vm8, %v1821_v54  ;;  %2054 = vmatpush1.bf16.msra.mxu0 %v2428_v46 }
  0xb6   :  { %2062 = vmatprep.subr.bf16.mxu0 %v2402_v17 }
  0xb8   :  { %1935 = vmatmul.mubr.msk.f32.gmra.mrb[10].mxu1 %vm100_vm8, %v1822_v56 }
  0xb9   :  { %1945 = vmatprep.mubr.msk.f32.mxu1 %vm2323_vm2, %v2321_v1 }
  0xbc   :  { %1946 = vmatmul.mubr.msk.f32.vlgmr.msra.gmra.mrb[12].mxu1 %vm387_vm1, %v2321_v1 }
  0xbd   :  { %2057 = vmatpush3.bf16.msra.mxu1 %v2453_v60  ;;  %1956 = vmatprep.mubr.msk.f32.mxu1 %vm2323_vm2, %v2321_v1 }
  0xbe   :  { %2058 = vmatprep.subr.bf16.mxu1 %v2322_v57 }
  0xc1   :  { %2060 = vmatpush3.bf16.msra.mxu1 %v2461_v0 }
  0xc2   :  { %2069 = vmatprep.subr.bf16.mxu1 %v2322_v57 }
 0x177   :  { %v2488_v2 = vpop.f32.mrb[0].mxu1 }
 0x178   :  { %v2490_v3 = vpop.f32.mrb[1].mxu1 }
 0x17b   :  { %v2492_v4 = vpop.f32.mrb[2].mxu1 }
 0x17c   :  { %v2494_v5 = vpop.f32.mrb[3].mxu1 }
 0x17f   :  { %v2496_v6 = vpop.f32.mrb[4].mxu1 }
 0x180   :  { %v304_v7 = vpop.f32.mrb[5].mxu1 }
 0x183   :  { %v2503_v9 = vpop.f32.mrb[6].mxu1  ;;  %v457_v10 = vpop.f32.mrb[0].mxu0 }
 0x184   :  { %v458_v11 = vadd.f32 %v457_v10, %v2501_v8  ;;  %v2506_v12 = vpop.f32.mrb[7].mxu1  ;;  %v459_v13 = vpop.f32.mrb[1].mxu0 }
 0x185   :  { %v460_v16 = vadd.f32 %v459_v13, %v2511_v14 }
 0x186   :  { %v1841_v15 = vmul.f32 -1.442695, %v458_v11  ;;  %v734_v11 = vpop.permute.xlu1 %733 }
 0x187   :  { %v2514_v18 = vpop.f32.mrb[8].mxu1  ;;  %v1842_v20 = vmul.f32 -1.442695, %v460_v16  ;;  %vm735_vm4 = vcmp.eq.s32.totalorder %v734_v11, 1 }
 0x188   :  { %2189 = vpow2.f32 %v1841_v15  ;;  %v2516_v19 = vpop.f32.mrb[9].mxu1 }
 0x189   :  { %2191 = vpow2.f32 %v1842_v20 }
 0x18b   :  { %v2518_v21 = vpop.f32.mrb[10].mxu1 }
 0x18c   :  { %v2520_v22 = vpop.f32.mrb[11].mxu1 }
 0x18f   :  { %v528_v23 = vpop.f32.mrb[12].mxu1 }
 0x190   :  { %v1947_v24 = vpop.f32.mrb[13].mxu1  ;;  %v529_v30 = vadd.f32 %v528_v23, %v2525_v28 }
 0x192   :  { %v2190_v25 = vpop.eup %2189 }
 0x193   :  { %v536_v26 = vadd.f32 1.0, %v2190_v25  ;;  %v2192_v27 = vpop.eup %2191 }
 0x194   :  { %v543_v29 = vadd.f32 1.0, %v2192_v27 }
 0x195   :  { %2193 = vrcp.f32 %v536_v26 }
 0x196   :  { %2195 = vrcp.f32 %v543_v29 }
 0x19f   :  { %v2194_v31 = vpop.eup %2193 }
 0x1a0   :  { %v546_v32 = vmul.f32 %v2194_v31, %v529_v30  ;;  %v2196_v34 = vpop.eup %2195 }
 0x1a1   :  { %v549_v35 = vsub.f32 1.0, %v2196_v34  ;;  %v551_v38 = vmul.f32 0.0, %v2196_v34 }
 0x1a2   :  { %v547_v33 = vadd.f32 %v546_v32, %v304_v7 }
 0x1a4   :  { %2197 = vtanh.f32 %v547_v33 }
 0x1ae   :  { %v2198_v36 = vpop.eup %2197 }
 0x1af   :  { %v550_v41 = vmul.f32 %v2198_v36, %v549_v35 }
 0x1b1   :  { %v552_v42 = vadd.f32 %v551_v38, %v550_v41 }
 0x1b3   :  { %v559_v43 = vsel %vm558_vm3, %v552_v42, 0.0 }
 0x1b4   :  { %1843 = vmatmul.mubr.msk.f32.vlgmr.msra.gmra.mrb[2].mxu0 %vm387_vm1, %v559_v43  ;;  %1957 = vmatmul.mubr.msk.f32.vlgmr.msra.gmra.mrb[14].mxu1 %vm387_vm1, %v559_v43 }
 0x1b5   :  { %2064 = vmatpush1.bf16.msra.mxu0 %v2420_v39  ;;  %2071 = vmatpush3.bf16.msra.mxu1 %v2453_v60 }
 0x1b6   :  { %2066 = vmatprep.subr.bf16.mxu0 %v2422_v40  ;;  %2072 = vmatprep.subr.bf16.mxu1 %v2322_v57 }
 0x1b7   :  { %809 = vmatprep.mubr.f32.mxu0 %v2321_v1  ;;  %1967 = vmatprep.mubr.msk.f32.mxu1 %vm2323_vm2, %v2321_v1 }
 0x1b9   :  { %2068 = vmatpush1.bf16.msra.mxu0 %v2428_v46  ;;  %2074 = vmatpush3.bf16.msra.mxu1 %v2461_v0 }
 0x1ba   :  { %2076 = vmatprep.subr.bf16.mxu0 %v2402_v17  ;;  %2083 = vmatprep.subr.bf16.mxu1 %v2322_v57 }
 0x287   :  { %v634_v44 = vpop.f32.mrb[2].mxu0  ;;  %v705_v45 = vpop.f32.mrb[14].mxu1 }
 0x288   :  { %v635_v47 = vadd.f32 %v634_v44, %v2501_v8  ;;  %v636_v48 = vpop.f32.mrb[3].mxu0  ;;  %v1958_v49 = vpop.f32.mrb[15].mxu1  ;;  %v706_v58 = vadd.f32 %v705_v45, %v2525_v28 }
 0x289   :  { %v637_v51 = vadd.f32 %v636_v48, %v2511_v14  ;;  %v911_v44 = vpop.permute.xlu0 %910 }
 0x28a   :  { %v1845_v50 = vmul.f32 -1.442695, %v635_v47  ;;  %vm912_vm5 = vcmp.eq.s32.totalorder %v911_v44, 1 }
 0x28b   :  { %v1846_v52 = vmul.f32 -1.442695, %v637_v51 }
 0x28c   :  { %2199 = vpow2.f32 %v1845_v50 }
 0x28d   :  { %2201 = vpow2.f32 %v1846_v52 }
 0x296   :  { %v2200_v53 = vpop.eup %2199 }
 0x297   :  { %v713_v54 = vadd.f32 1.0, %v2200_v53  ;;  %v2202_v55 = vpop.eup %2201 }
 0x298   :  { %v720_v56 = vadd.f32 1.0, %v2202_v55 }
 0x299   :  { %2203 = vrcp.f32 %v713_v54 }
 0x29a   :  { %2205 = vrcp.f32 %v720_v56 }
 0x2a3   :  { %v2204_v59 = vpop.eup %2203 }
 0x2a4   :  { %v723_v61 = vmul.f32 %v2204_v59, %v706_v58  ;;  %v2206_v63 = vpop.eup %2205 }
 0x2a5   :  { %v726_v7 = vsub.f32 1.0, %v2206_v63  ;;  %v728_v15 = vmul.f32 %v2206_v63, %v559_v43 }
 0x2a6   :  { %v724_v62 = vadd.f32 %v2496_v6, %v723_v61 }
 0x2a8   :  { %2207 = vtanh.f32 %v724_v62 }
 0x2b2   :  { %v2208_v10 = vpop.eup %2207 }
 0x2b3   :  { %v727_v13 = vmul.f32 %v2208_v10, %v726_v7 }
 0x2b5   :  { %v729_v16 = vadd.f32 %v728_v15, %v727_v13 }
 0x2b7   :  { %v736_v20 = vsel %vm735_vm4, %v729_v16, %v559_v43 }
 0x2b8   :  { %1847 = vmatmul.mubr.msk.f32.vlgmr.msra.gmra.mrb[4].mxu0 %vm387_vm1, %v736_v20  ;;  %1968 = vmatmul.mubr.msk.f32.vlgmr.msra.gmra.mrb[16].mxu1 %vm387_vm1, %v736_v20 }
 0x2b9   :  { %2078 = vmatpush1.bf16.msra.mxu0 %v2420_v39  ;;  %2085 = vmatpush3.bf16.msra.mxu1 %v2453_v60 }
 0x2ba   :  { %2080 = vmatprep.subr.bf16.mxu0 %v2422_v40  ;;  %2086 = vmatprep.subr.bf16.mxu1 %v2322_v57 }
 0x2bb   :  { %986 = vmatprep.mubr.f32.mxu0 %v2321_v1  ;;  %1978 = vmatprep.mubr.msk.f32.mxu1 %vm2323_vm2, %v2321_v1 }
 0x2bd   :  { %2082 = vmatpush1.bf16.msra.mxu0 %v2428_v46  ;;  %2088 = vmatpush3.bf16.msra.mxu1 %v2461_v0 }
 0x2be   :  { %2090 = vmatprep.subr.bf16.mxu0 %v2402_v17  ;;  %2097 = vmatprep.subr.bf16.mxu1 %v2322_v57 }
 0x38b   :  { %v811_v6 = vpop.f32.mrb[4].mxu0  ;;  %v882_v23 = vpop.f32.mrb[16].mxu1 }
 0x38c   :  { %v812_v24 = vadd.f32 %v811_v6, %v2501_v8  ;;  %v813_v25 = vpop.f32.mrb[5].mxu0  ;;  %v1969_v26 = vpop.f32.mrb[17].mxu1  ;;  %v883_v35 = vadd.f32 %v882_v23, %v2525_v28 }
 0x38d   :  { %v814_v29 = vadd.f32 %v813_v25, %v2511_v14 }
 0x38e   :  { %v1849_v27 = vmul.f32 -1.442695, %v812_v24 }
 0x38f   :  { %v1850_v30 = vmul.f32 -1.442695, %v814_v29 }
 0x390   :  { %2209 = vpow2.f32 %v1849_v27 }
 0x391   :  { %2211 = vpow2.f32 %v1850_v30 }
 0x39a   :  { %v2210_v31 = vpop.eup %2209 }
 0x39b   :  { %v890_v32 = vadd.f32 1.0, %v2210_v31  ;;  %v2212_v33 = vpop.eup %2211 }
 0x39c   :  { %v897_v34 = vadd.f32 1.0, %v2212_v33 }
 0x39d   :  { %2213 = vrcp.f32 %v890_v32 }
 0x39e   :  { %2215 = vrcp.f32 %v897_v34 }
 0x3a7   :  { %v2214_v36 = vpop.eup %2213 }
 0x3a8   :  { %v900_v37 = vmul.f32 %v2214_v36, %v883_v35  ;;  %v2216_v41 = vpop.eup %2215 }
 0x3a9   :  { %v903_v42 = vsub.f32 1.0, %v2216_v41  ;;  %v905_v47 = vmul.f32 %v2216_v41, %v736_v20 }
 0x3aa   :  { %v901_v38 = vadd.f32 %v900_v37, %v2506_v12 }
 0x3ac   :  { %2217 = vtanh.f32 %v901_v38 }
 0x3b6   :  { %v2218_v43 = vpop.eup %2217 }
 0x3b7   :  { %v904_v45 = vmul.f32 %v2218_v43, %v903_v42 }
 0x3b9   :  { %v906_v48 = vadd.f32 %v905_v47, %v904_v45 }
 0x3bb   :  { %v913_v49 = vsel %vm912_vm5, %v906_v48, %v736_v20  ;;  %v1088_v20 = vpop.permute.xlu1 %1087  ;;  %v1265_v48 = vpop.permute.xlu0 %1264 }
 0x3bc   :  { %1851 = vmatmul.mubr.msk.f32.vlgmr.msra.gmra.mrb[6].mxu0 %vm387_vm1, %v913_v49  ;;  %1979 = vmatmul.mubr.msk.f32.vlgmr.msra.gmra.mrb[18].mxu1 %vm387_vm1, %v913_v49  ;;  %vm1089_vm6 = vcmp.eq.s32.totalorder %v1088_v20, 1  ;;  %vm1266_vm7 = vcmp.eq.s32.totalorder %v1265_v48, 1 }
 0x3bd   :  { %2092 = vmatpush1.bf16.msra.mxu0 %v2420_v39  ;;  %2099 = vmatpush3.bf16.msra.mxu1 %v2453_v60 }
 0x3be   :  { %2094 = vmatprep.subr.bf16.mxu0 %v2422_v40  ;;  %2100 = vmatprep.subr.bf16.mxu1 %v2322_v57 }
 0x3bf   :  { %1163 = vmatprep.mubr.f32.mxu0 %v2321_v1  ;;  %1989 = vmatprep.mubr.msk.f32.mxu1 %vm2323_vm2, %v2321_v1 }
 0x3c1   :  { %2096 = vmatpush1.bf16.msra.mxu0 %v2428_v46  ;;  %2102 = vmatpush3.bf16.msra.mxu1 %v2461_v0 }
 0x3c2   :  { %2104 = vmatprep.subr.bf16.mxu0 %v2402_v17  ;;  %2111 = vmatprep.subr.bf16.mxu1 %v2322_v57 }
 0x48f   :  { %v988_v12 = vpop.f32.mrb[6].mxu0  ;;  %v1059_v50 = vpop.f32.mrb[18].mxu1 }
 0x490   :  { %v989_v51 = vadd.f32 %v988_v12, %v2501_v8  ;;  %v990_v52 = vpop.f32.mrb[7].mxu0  ;;  %v1980_v53 = vpop.f32.mrb[19].mxu1  ;;  %v1060_v63 = vadd.f32 %v1059_v50, %v2525_v28 }
 0x491   :  { %v991_v55 = vadd.f32 %v990_v52, %v2511_v14 }
 0x492   :  { %v1853_v54 = vmul.f32 -1.442695, %v989_v51 }
 0x493   :  { %v1854_v56 = vmul.f32 -1.442695, %v991_v55 }
 0x494   :  { %2219 = vpow2.f32 %v1853_v54 }
 0x495   :  { %2221 = vpow2.f32 %v1854_v56 }
 0x49e   :  { %v2220_v58 = vpop.eup %2219 }
 0x49f   :  { %v1067_v59 = vadd.f32 1.0, %v2220_v58  ;;  %v2222_v61 = vpop.eup %2221 }
 0x4a0   :  { %v1074_v62 = vadd.f32 1.0, %v2222_v61 }
 0x4a1   :  { %2223 = vrcp.f32 %v1067_v59 }
 0x4a2   :  { %2225 = vrcp.f32 %v1074_v62 }
 0x4ab   :  { %v2224_v7 = vpop.eup %2223 }
 0x4ac   :  { %v1077_v10 = vmul.f32 %v2224_v7, %v1060_v63  ;;  %v2226_v13 = vpop.eup %2225 }
 0x4ad   :  { %v1080_v15 = vsub.f32 1.0, %v2226_v13  ;;  %v1082_v23 = vmul.f32 %v2226_v13, %v913_v49 }
 0x4ae   :  { %v1078_v11 = vadd.f32 %v2503_v9, %v1077_v10 }
 0x4b0   :  { %2227 = vtanh.f32 %v1078_v11 }
 0x4ba   :  { %v2228_v16 = vpop.eup %2227 }
 0x4bb   :  { %v1081_v6 = vmul.f32 %v2228_v16, %v1080_v15 }
 0x4bd   :  { %v1083_v24 = vadd.f32 %v1082_v23, %v1081_v6  ;;  %v1442_v6 = vpop.permute.xlu1 %1441 }
 0x4be   :  { %vm1443_vm8 = vcmp.eq.s32.totalorder %v1442_v6, 1 }
 0x4bf   :  { %v1090_v25 = vsel %vm1089_vm6, %v1083_v24, %v913_v49 }
 0x4c0   :  { %1855 = vmatmul.mubr.msk.f32.vlgmr.msra.gmra.mrb[8].mxu0 %vm387_vm1, %v1090_v25  ;;  %1990 = vmatmul.mubr.msk.f32.vlgmr.msra.gmra.mrb[20].mxu1 %vm387_vm1, %v1090_v25 }
 0x4c1   :  { %2106 = vmatpush1.bf16.msra.mxu0 %v2420_v39  ;;  %2113 = vmatpush3.bf16.msra.mxu1 %v2453_v60 }
 0x4c2   :  { %2108 = vmatprep.subr.bf16.mxu0 %v2422_v40  ;;  %2114 = vmatprep.subr.bf16.mxu1 %v2322_v57 }
 0x4c3   :  { %1340 = vmatprep.mubr.f32.mxu0 %v2321_v1  ;;  %2000 = vmatprep.mubr.msk.f32.mxu1 %vm2323_vm2, %v2321_v1 }
 0x4c5   :  { %2110 = vmatpush1.bf16.msra.mxu0 %v2428_v46  ;;  %2116 = vmatpush3.bf16.msra.mxu1 %v2461_v0 }
 0x4c6   :  { %2118 = vmatprep.subr.bf16.mxu0 %v2402_v17  ;;  %2125 = vmatprep.subr.bf16.mxu1 %v2322_v57 }
 0x593   :  { %v1165_v9 = vpop.f32.mrb[8].mxu0  ;;  %v1236_v26 = vpop.f32.mrb[20].mxu1 }
 0x594   :  { %v1166_v27 = vadd.f32 %v1165_v9, %v2501_v8  ;;  %v1167_v29 = vpop.f32.mrb[9].mxu0  ;;  %v1991_v30 = vpop.f32.mrb[21].mxu1  ;;  %v1237_v38 = vadd.f32 %v1236_v26, %v2525_v28 }
 0x595   :  { %v1168_v32 = vadd.f32 %v1167_v29, %v2511_v14 }
 0x596   :  { %v1857_v31 = vmul.f32 -1.442695, %v1166_v27 }
 0x597   :  { %v1858_v33 = vmul.f32 -1.442695, %v1168_v32 }
 0x598   :  { %2229 = vpow2.f32 %v1857_v31 }
 0x599   :  { %2231 = vpow2.f32 %v1858_v33 }
 0x5a2   :  { %v2230_v34 = vpop.eup %2229 }
 0x5a3   :  { %v1244_v35 = vadd.f32 1.0, %v2230_v34  ;;  %v2232_v36 = vpop.eup %2231 }
 0x5a4   :  { %v1251_v37 = vadd.f32 1.0, %v2232_v36 }
 0x5a5   :  { %2233 = vrcp.f32 %v1244_v35 }
 0x5a6   :  { %2235 = vrcp.f32 %v1251_v37 }
 0x5af   :  { %v2234_v41 = vpop.eup %2233 }
 0x5b0   :  { %v1254_v42 = vmul.f32 %v2234_v41, %v1237_v38  ;;  %v2236_v44 = vpop.eup %2235  ;;  %v1619_v38 = vpop.permute.xlu0 %1618 }
 0x5b1   :  { %v1257_v45 = vsub.f32 1.0, %v2236_v44  ;;  %v1259_v12 = vmul.f32 %v2236_v44, %v1090_v25  ;;  %vm1620_vm9 = vcmp.eq.s32.totalorder %v1619_v38, 1 }
 0x5b2   :  { %v1255_v43 = vadd.f32 %v1254_v42, %v2516_v19 }
 0x5b4   :  { %2237 = vtanh.f32 %v1255_v43 }
 0x5be   :  { %v2238_v47 = vpop.eup %2237 }
 0x5bf   :  { %v1258_v49 = vmul.f32 %v2238_v47, %v1257_v45  ;;  %v2163_v45 = vadd.f32 %v2501_v8, %v2492_v4 }
 0x5c1   :  { %v1260_v50 = vadd.f32 %v1259_v12, %v1258_v49 }
 0x5c3   :  { %v1267_v51 = vsel %vm1266_vm7, %v1260_v50, %v1090_v25 }
 0x5c4   :  { %1859 = vmatmul.mubr.msk.f32.vlgmr.msra.gmra.mrb[10].mxu0 %vm387_vm1, %v1267_v51  ;;  %2001 = vmatmul.mubr.msk.f32.vlgmr.msra.gmra.mrb[22].mxu1 %vm387_vm1, %v1267_v51 }
 0x5c5   :  { %2120 = vmatpush1.bf16.msra.mxu0 %v2420_v39  ;;  %2127 = vmatpush3.bf16.msra.mxu1 %v2453_v60 }
 0x5c6   :  { %2122 = vmatprep.subr.bf16.mxu0 %v2422_v40  ;;  %2128 = vmatprep.subr.bf16.mxu1 %v2322_v57 }
 0x5c7   :  { %1517 = vmatprep.mubr.f32.mxu0 %v2321_v1  ;;  %2011 = vmatprep.mubr.msk.f32.mxu1 %vm2323_vm2, %v2321_v1 }
 0x5c9   :  { %2124 = vmatpush1.bf16.msra.mxu0 %v2428_v46  ;;  %2130 = vmatpush3.bf16.msra.mxu1 %v2461_v0 }
 0x5ca   :  { %2132 = vmatprep.subr.bf16.mxu0 %v2402_v17  ;;  %2139 = vmatprep.subr.bf16.mxu1 %v2322_v57 }
 0x697   :  { %v1342_v19 = vpop.f32.mrb[10].mxu0  ;;  %v1413_v52 = vpop.f32.mrb[22].mxu1 }
 0x698   :  { %v1343_v53 = vadd.f32 %v1342_v19, %v2501_v8  ;;  %v1344_v54 = vpop.f32.mrb[11].mxu0  ;;  %v2002_v55 = vpop.f32.mrb[23].mxu1  ;;  %v1414_v17 = vadd.f32 %v1413_v52, %v2525_v28 }
 0x699   :  { %v1345_v58 = vadd.f32 %v1344_v54, %v2511_v14 }
 0x69a   :  { %v1861_v56 = vmul.f32 -1.442695, %v1343_v53 }
 0x69b   :  { %v1862_v59 = vmul.f32 -1.442695, %v1345_v58 }
 0x69c   :  { %2239 = vpow2.f32 %v1861_v56 }
 0x69d   :  { %2241 = vpow2.f32 %v1862_v59 }
 0x6a6   :  { %v2240_v61 = vpop.eup %2239 }
 0x6a7   :  { %v1421_v62 = vadd.f32 1.0, %v2240_v61  ;;  %v2242_v63 = vpop.eup %2241 }
 0x6a8   :  { %v1428_v7 = vadd.f32 1.0, %v2242_v63 }
 0x6a9   :  { %2243 = vrcp.f32 %v1421_v62  ;;  %v1796_v62 = vpop.permute.xlu1 %1795 }
 0x6aa   :  { %2245 = vrcp.f32 %v1428_v7  ;;  %vm1797_vm10 = vcmp.eq.s32.totalorder %v1796_v62, 1 }
 0x6b3   :  { %v2244_v10 = vpop.eup %2243 }
 0x6b4   :  { %v1431_v11 = vmul.f32 %v2244_v10, %v1414_v17  ;;  %v2246_v15 = vpop.eup %2245 }
 0x6b5   :  { %v1434_v16 = vsub.f32 1.0, %v2246_v15  ;;  %v1436_v24 = vmul.f32 %v2246_v15, %v1267_v51 }
 0x6b6   :  { %v1432_v13 = vadd.f32 %v2514_v18, %v1431_v11  ;;  %v2159_v18 = vadd.f32 %v2501_v8, %v2488_v2 }
 0x6b8   :  { %2247 = vtanh.f32 %v1432_v13 }
 0x6c2   :  { %v2248_v20 = vpop.eup %2247 }
 0x6c3   :  { %v1435_v23 = vmul.f32 %v2248_v20, %v1434_v16 }
 0x6c5   :  { %v1437_v25 = vadd.f32 %v1436_v24, %v1435_v23 }
 0x6c7   :  { %v1444_v9 = vsel %vm1443_vm8, %v1437_v25, %v1267_v51 }
 0x6c8   :  { %1863 = vmatmul.mubr.msk.f32.vlgmr.msra.gmra.mrb[12].mxu0 %vm387_vm1, %v1444_v9  ;;  %2012 = vmatmul.mubr.msk.f32.vlgmr.msra.gmra.mrb[24].mxu1 %vm387_vm1, %v1444_v9 }
 0x6c9   :  { %2134 = vmatpush1.bf16.msra.mxu0 %v2420_v39  ;;  %2141 = vmatpush3.bf16.msra.mxu1 %v2453_v60  ;;  %v2161_v39 = vadd.f32 %v2511_v14, %v2490_v3 }
 0x6ca   :  { %2136 = vmatprep.subr.bf16.mxu0 %v2422_v40  ;;  %2142 = vmatprep.subr.bf16.mxu1 %v2322_v57 }
 0x6cb   :  { %1694 = vmatprep.mubr.f32.mxu0 %v2321_v1  ;;  %2022 = vmatprep.mubr.msk.f32.mxu1 %vm2323_vm2, %v2321_v1 }
 0x6cd   :  { %2138 = vmatpush1.bf16.msra.mxu0 %v2428_v46  ;;  %2144 = vmatpush3.bf16.msra.mxu1 %v2461_v0 }
 0x79b   :  { %v1519_v60 = vpop.f32.mrb[12].mxu0  ;;  %v1590_v26 = vpop.f32.mrb[24].mxu1 }
 0x79c   :  { %v2160_v40 = vadd.f32 %v2159_v18, %v1519_v60  ;;  %v1521_v27 = vpop.f32.mrb[13].mxu0  ;;  %v2013_v57 = vpop.f32.mrb[25].mxu1  ;;  %v1591_v2 = vadd.f32 %v1590_v26, %v2525_v28 }
 0x79d   :  { %v2162_v29 = vadd.f32 %v2161_v39, %v1521_v27 }
 0x79e   :  { %v1865_v30 = vmul.f32 -1.442695, %v2160_v40 }
 0x79f   :  { %v1866_v31 = vmul.f32 -1.442695, %v2162_v29 }
 0x7a0   :  { %2249 = vpow2.f32 %v1865_v30 }
 0x7a1   :  { %2251 = vpow2.f32 %v1866_v31 }
 0x7aa   :  { %v2250_v1 = vpop.eup %2249 }
 0x7ab   :  { %v1598_v46 = vadd.f32 1.0, %v2250_v1  ;;  %v2252_v0 = vpop.eup %2251 }
 0x7ac   :  { %v1605_v32 = vadd.f32 1.0, %v2252_v0 }
 0x7ad   :  { %2253 = vrcp.f32 %v1598_v46 }
 0x7ae   :  { %2255 = vrcp.f32 %v1605_v32 }
 0x7b7   :  { %v2254_v33 = vpop.eup %2253 }
 0x7b8   :  { %v1608_v34 = vmul.f32 %v2254_v33, %v1591_v2  ;;  %v2256_v35 = vpop.eup %2255 }
 0x7b9   :  { %v1611_v36 = vsub.f32 1.0, %v2256_v35  ;;  %v1613_v42 = vmul.f32 %v2256_v35, %v1444_v9 }
 0x7ba   :  { %v1609_v3 = vadd.f32 %v1608_v34, %v2520_v22  ;;  %v2165_v22 = vadd.f32 %v2511_v14, %v2494_v5 }
 0x7bc   :  { %2257 = vtanh.f32 %v1609_v3 }
 0x7c6   :  { %v2258_v37 = vpop.eup %2257 }
 0x7c7   :  { %v1612_v41 = vmul.f32 %v2258_v37, %v1611_v36 }
 0x7c9   :  { %v1614_v43 = vadd.f32 %v1613_v42, %v1612_v41 }
 0x7cb   :  { %v1621_v44 = vsel %vm1620_vm9, %v1614_v43, %v1444_v9 }
 0x7cc   :  { %1867 = vmatmul.mubr.msk.f32.vlgmr.msra.gmra.mrb[14].mxu0 %vm387_vm1, %v1621_v44  ;;  %2023 = vmatmul.mubr.msk.f32.vlgmr.msra.gmra.mrb[26].mxu1 %vm387_vm1, %v1621_v44 }
 0x89f   :  { %v1696_v47 = vpop.f32.mrb[14].mxu0  ;;  %v1767_v48 = vpop.f32.mrb[26].mxu1 }
 0x8a0   :  { %v2164_v49 = vadd.f32 %v2163_v45, %v1696_v47  ;;  %v1698_v12 = vpop.f32.mrb[15].mxu0  ;;  %v2024_v50 = vpop.f32.mrb[27].mxu1  ;;  %v1768_v4 = vadd.f32 %v1767_v48, %v2525_v28 }
 0x8a1   :  { %v2166_v51 = vadd.f32 %v2165_v22, %v1698_v12 }
 0x8a2   :  { %v1869_v19 = vmul.f32 -1.442695, %v2164_v49 }
 0x8a3   :  { %v1870_v52 = vmul.f32 -1.442695, %v2166_v51 }
 0x8a4   :  { %2259 = vpow2.f32 %v1869_v19 }
 0x8a5   :  { %2261 = vpow2.f32 %v1870_v52 }
 0x8ae   :  { %v2260_v53 = vpop.eup %2259 }
 0x8af   :  { %v1775_v54 = vadd.f32 1.0, %v2260_v53  ;;  %v2262_v55 = vpop.eup %2261 }
 0x8b0   :  { %v1782_v56 = vadd.f32 1.0, %v2262_v55 }
 0x8b1   :  { %2263 = vrcp.f32 %v1775_v54 }
 0x8b2   :  { %2265 = vrcp.f32 %v1782_v56 }
 0x8bb   :  { %v2264_v8 = vpop.eup %2263 }
 0x8bc   :  { %v1785_v58 = vmul.f32 %v2264_v8, %v1768_v4  ;;  %v2266_v14 = vpop.eup %2265 }
 0x8bd   :  { %v1788_v59 = vsub.f32 1.0, %v2266_v14  ;;  %v1790_v7 = vmul.f32 %v2266_v14, %v1621_v44 }
 0x8be   :  { %v1786_v5 = vadd.f32 %v2518_v21, %v1785_v58 }
 0x8c0   :  { %2267 = vtanh.f32 %v1786_v5 }
 0x8ca   :  { %v2268_v61 = vpop.eup %2267 }
 0x8cb   :  { %v1789_v63 = vmul.f32 %v2268_v61, %v1788_v59 }
 0x8cd   :  { %v1791_v17 = vadd.f32 %v1790_v7, %v1789_v63 }
 0x8cf   :  { %v1798_v10 = vsel %vm1797_vm10, %v1791_v17, %v1621_v44 }
 0x8d0   :  { %1799 = vst [vmem:[#allocation6] sm:$0xff] %v1798_v10 }
 0x8d1   :  { %2302 = shalt.err (!%p2299_p12)
}
 0x8d2   :  { %s2303_s17 = scalar_lea.hbm %s2655_s5, 128 }
 0x8d3   :  { %p2304_p13 = scmp.ne.s32.totalorder %s2655_s5, %s2303_s17  ;;  %p2307_p0 = scmp.lt.u32.totalorder %s2303_s17, %s2655_s5 }
 0x8d5   :  { %p2309_p1 = pnand %p2307_p0, %p2304_p13 }
 0x8d7   :  { %2312 = shalt.err (!%p2309_p1)
}
 0x8d8   :  { %1809 = dma.vmem_to_hbm [thread:$0]  %s1807_s13, 128, %s2655_s5, [#allocation5]  }
 0x8d9   :  { %2315 = dma.done.wait [#allocation5], 128  }
 0x8da   :  { %2316 = vsyncadd [#allocation5], 4294967168 }
 0x8db   :  { %1813 = vsyncpa [#allocation4], 1 }
 0x8dc   :  { %1814 = vsyncpa [#allocation5], 1 }

</bundles_post_ra>
